<compile_context>
chip_gen: v7x
topology: tpu7x:2x2x1
jax: 0.10.0
libtpu: 0.0.40
codegen_flags: <defaults>
</compile_context>

<pallas_src>
import math

import jax
import jax.numpy as jnp
from jax.experimental import pallas as pl
from jax.experimental.pallas import tpu as pltpu

# ---------------- synthetic "bert config" ----------------
VOCAB = 100
MAX_POS = 16
TYPE_VOCAB = 2
HIDDEN = 32
NUM_LAYERS = 2
NUM_HEADS = 2
HEAD_DIM = HIDDEN // NUM_HEADS
INTERMEDIATE = 64
NUM_CLASSES = 4
LN_EPS = 1e-12

BATCH = 2
SEQ = 8


# ---------------- fused forward kernel ----------------
def _fused_forward_kernel(
    emb_ref,                 # (B*S, H)   summed word+pos+type embeddings
    bias_ref,                # (B, S)     additive attention bias (0 / -1e4)
    emb_g_ref, emb_b_ref,    # (1, H)
    qkv_w_ref,               # (L, H, 3H) fused Q|K|V projection
    qkv_b_ref,               # (L, 1, 3H)
    ao_w_ref,                # (L, H, H)  attention output projection
    ao_b_ref,                # (L, 1, H)
    ln1_g_ref, ln1_b_ref,    # (L, 1, H)
    i_w_ref,                 # (L, H, I)
    i_b_ref,                 # (L, 1, I)
    o_w_ref,                 # (L, I, H)
    o_b_ref,                 # (L, 1, H)
    ln2_g_ref, ln2_b_ref,    # (L, 1, H)
    fc_w_ref,                # (H, C)
    fc_b_ref,                # (1, C)
    out_ref,                 # (B, C)
):
    f32 = jnp.float32

    def layer_norm(x, g, b):
        mean = jnp.mean(x, axis=-1, keepdims=True)
        var = jnp.mean((x - mean) * (x - mean), axis=-1, keepdims=True)
        return (x - mean) * jax.lax.rsqrt(var + LN_EPS) * g + b

    def gelu(y):
        # TODO(synk): HF BERT default is exact erf-GELU; tanh approximation used here.
        c = f32(math.sqrt(2.0 / math.pi))
        return 0.5 * y * (1.0 + jnp.tanh(c * (y + 0.044715 * y * y * y)))

    # ---- embeddings -> LayerNorm ----
    x = layer_norm(emb_ref[...].astype(f32), emb_g_ref[...], emb_b_ref[...])   # (B*S, H)

    bias_b1s = bias_ref[...][:, None, :]          # (B, 1, S), bcast over query rows
    scale = f32(1.0 / math.sqrt(HEAD_DIM))

    # ---- encoder layers (static unroll; all weights VMEM-resident) ----
    for l in range(NUM_LAYERS):
        # fused QKV projection: single (B*S, H) @ (H, 3H) matmul
        qkv = jnp.dot(x, qkv_w_ref[l], preferred_element_type=f32) + qkv_b_ref[l]  # (B*S, 3H)

        ao_w_l = ao_w_ref[l]                      # (H, H)
        attn_acc = None
        for h in range(NUM_HEADS):
            q = qkv[:, h * HEAD_DIM:(h + 1) * HEAD_DIM]
            k = qkv[:, HIDDEN + h * HEAD_DIM:HIDDEN + (h + 1) * HEAD_DIM]
            v = qkv[:, 2 * HIDDEN + h * HEAD_DIM:2 * HIDDEN + (h + 1) * HEAD_DIM]
            q = q.reshape(BATCH, SEQ, HEAD_DIM)
            k = k.reshape(BATCH, SEQ, HEAD_DIM)
            v = v.reshape(BATCH, SEQ, HEAD_DIM)

            s = jnp.einsum("bqd,bkd->bqk", q, k, preferred_element_type=f32) * scale
            s = s + bias_b1s                       # (B, S, S)
            m = jnp.max(s, axis=-1, keepdims=True)
            p = jnp.exp(s - m)
            p = p / jnp.sum(p, axis=-1, keepdims=True)
            ctx = jnp.einsum("bqk,bkd->bqd", p, v, preferred_element_type=f32)   # (B, S, D)
            ctx2 = ctx.reshape(BATCH * SEQ, HEAD_DIM)

            # merged-heads output projection, fused per head:
            # concat_h(ctx_h) @ W_o  ==  sum_h ctx_h @ W_o[h*D:(h+1)*D, :]
            contrib = jnp.dot(ctx2, ao_w_l[h * HEAD_DIM:(h + 1) * HEAD_DIM, :],
                              preferred_element_type=f32)
            attn_acc = contrib if attn_acc is None else attn_acc + contrib

        attn_out = attn_acc + ao_b_ref[l]
        x = layer_norm(attn_out + x, ln1_g_ref[l], ln1_b_ref[l])

        inter = gelu(jnp.dot(x, i_w_ref[l], preferred_element_type=f32) + i_b_ref[l])
        ffn = jnp.dot(inter, o_w_ref[l], preferred_element_type=f32) + o_b_ref[l]
        x = layer_norm(ffn + x, ln2_g_ref[l], ln2_b_ref[l])

    # ---- CLS token (row b*SEQ of x) picked via a tiny selection matmul ----
    row = jax.lax.broadcasted_iota(jnp.int32, (BATCH, BATCH * SEQ), 0)
    col = jax.lax.broadcasted_iota(jnp.int32, (BATCH, BATCH * SEQ), 1)
    sel = (col == row * SEQ).astype(f32)                       # (B, B*S)
    cls = jnp.dot(sel, x, preferred_element_type=f32)          # (B, H)

    # nn.Dropout(p=0.1) is identity in eval/inference mode.
    logits = jnp.dot(cls, fc_w_ref[...], preferred_element_type=f32) + fc_b_ref[...]
    out_ref[...] = logits.astype(out_ref.dtype)


# ---------------- deterministic parameter init ----------------
def init_params(seed=0):
    key = jax.random.PRNGKey(seed)
    keys = iter(jax.random.split(key, 32))

    def w(shape):
        return jax.random.normal(next(keys), shape, jnp.float32) * 0.02

    L, H, I, C = NUM_LAYERS, HIDDEN, INTERMEDIATE, NUM_CLASSES
    return {
        "word_emb": w((VOCAB, H)),
        "pos_emb": w((MAX_POS, H)),
        "type_emb": w((TYPE_VOCAB, H)),
        "emb_ln_g": jnp.ones((1, H), jnp.float32),
        "emb_ln_b": jnp.zeros((1, H), jnp.float32),
        # per-layer weights stacked along a leading layer dim; Q|K|V fused.
        "qkv_w": w((L, H, 3 * H)),
        "qkv_b": jnp.zeros((L, 1, 3 * H), jnp.float32),
        "ao_w": w((L, H, H)),
        "ao_b": jnp.zeros((L, 1, H), jnp.float32),
        "ln1_g": jnp.ones((L, 1, H), jnp.float32),
        "ln1_b": jnp.zeros((L, 1, H), jnp.float32),
        "i_w": w((L, H, I)),
        "i_b": jnp.zeros((L, 1, I), jnp.float32),
        "o_w": w((L, I, H)),
        "o_b": jnp.zeros((L, 1, H), jnp.float32),
        "ln2_g": jnp.ones((L, 1, H), jnp.float32),
        "ln2_b": jnp.zeros((L, 1, H), jnp.float32),
        "fc_w": w((H, C)),
        "fc_b": jnp.zeros((1, C), jnp.float32),
    }


# ---------------- model forward ----------------
def base_model_forward(params, input_ids, attention_mask):
    B, S = input_ids.shape
    # Data-dependent embedding gather stays in plain-JAX glue.
    emb = (params["word_emb"][input_ids]
           + params["pos_emb"][jnp.arange(S)][None, :, :]
           + params["type_emb"][0][None, None, :])
    emb2 = emb.reshape(B * S, HIDDEN).astype(jnp.float32)
    bias = (1.0 - attention_mask.astype(jnp.float32)) * -10000.0   # (B, S)

    args = (
        emb2, bias,
        params["emb_ln_g"], params["emb_ln_b"],
        params["qkv_w"], params["qkv_b"],
        params["ao_w"], params["ao_b"],
        params["ln1_g"], params["ln1_b"],
        params["i_w"], params["i_b"],
        params["o_w"], params["o_b"],
        params["ln2_g"], params["ln2_b"],
        params["fc_w"], params["fc_b"],
    )
    vmem = pl.BlockSpec(memory_space=pltpu.MemorySpace.VMEM)
    return pl.pallas_call(
        _fused_forward_kernel,
        out_shape=jax.ShapeDtypeStruct((B, NUM_CLASSES), jnp.float32),
        in_specs=[vmem] * len(args),
        out_specs=vmem,
        compiler_params=pltpu.CompilerParams(vmem_limit_bytes=32 * 1024 * 1024),
    )(*args)


if __name__ == "__main__":
    params = init_params(seed=0)
    key = jax.random.PRNGKey(0)
    k_ids, _ = jax.random.split(key)
    input_ids = jax.random.randint(k_ids, (BATCH, SEQ), 0, VOCAB, dtype=jnp.int32)
    # first token always valid; pad the tail of the second example
    attention_mask = jnp.ones((BATCH, SEQ), jnp.int32).at[1, 6:].set(0)

    forward = jax.jit(base_model_forward)
    logits = forward(params, input_ids, attention_mask)
    jax.block_until_ready(logits)
    assert logits.shape == (BATCH, NUM_CLASSES)
    print("KERNEL_OK")
</pallas_src>

<mosaic_0001>
module attributes {stable_mosaic.version = 11 : i64} {
  func.func @_fused_forward_kernel(%arg0: memref<16x32xf32, #tpu.memory_space<vmem>>, %arg1: memref<2x8xf32, #tpu.memory_space<vmem>>, %arg2: memref<1x32xf32, #tpu.memory_space<vmem>>, %arg3: memref<1x32xf32, #tpu.memory_space<vmem>>, %arg4: memref<2x32x96xf32, #tpu.memory_space<vmem>>, %arg5: memref<2x1x96xf32, #tpu.memory_space<vmem>>, %arg6: memref<2x32x32xf32, #tpu.memory_space<vmem>>, %arg7: memref<2x1x32xf32, #tpu.memory_space<vmem>>, %arg8: memref<2x1x32xf32, #tpu.memory_space<vmem>>, %arg9: memref<2x1x32xf32, #tpu.memory_space<vmem>>, %arg10: memref<2x32x64xf32, #tpu.memory_space<vmem>>, %arg11: memref<2x1x64xf32, #tpu.memory_space<vmem>>, %arg12: memref<2x64x32xf32, #tpu.memory_space<vmem>>, %arg13: memref<2x1x32xf32, #tpu.memory_space<vmem>>, %arg14: memref<2x1x32xf32, #tpu.memory_space<vmem>>, %arg15: memref<2x1x32xf32, #tpu.memory_space<vmem>>, %arg16: memref<32x4xf32, #tpu.memory_space<vmem>>, %arg17: memref<1x4xf32, #tpu.memory_space<vmem>>, %arg18: memref<2x4xf32, #tpu.memory_space<vmem>>) attributes {dimension_semantics = [], scalar_prefetch = 0 : i64, scratch_operands = 0 : i64, tpu.core_type = #tpu.core_type<tc>} {
    %c0 = arith.constant 0 : index
    %c0_0 = arith.constant 0 : index
    %0 = vector.load %arg0[%c0, %c0_0] : memref<16x32xf32, #tpu.memory_space<vmem>>, vector<16x32xf32>
    %c0_1 = arith.constant 0 : index
    %c0_2 = arith.constant 0 : index
    %1 = vector.load %arg2[%c0_1, %c0_2] : memref<1x32xf32, #tpu.memory_space<vmem>>, vector<1x32xf32>
    %c0_3 = arith.constant 0 : index
    %c0_4 = arith.constant 0 : index
    %2 = vector.load %arg3[%c0_3, %c0_4] : memref<1x32xf32, #tpu.memory_space<vmem>>, vector<1x32xf32>
    %cst = arith.constant dense<0.000000e+00> : vector<16xf32>
    %3 = vector.multi_reduction <add>, %0, %cst [1] : vector<16x32xf32> to vector<16xf32>
    %4 = vector.shape_cast %3 : vector<16xf32> to vector<16x1xf32>
    %cst_5 = arith.constant 3.200000e+01 : f32
    %5 = vector.broadcast %cst_5 : f32 to vector<16x1xf32>
    %6 = arith.divf %4, %5 : vector<16x1xf32>
    %7 = vector.broadcast %6 : vector<16x1xf32> to vector<16x32xf32>
    %8 = arith.subf %0, %7 : vector<16x32xf32>
    %9 = vector.broadcast %6 : vector<16x1xf32> to vector<16x32xf32>
    %10 = arith.subf %0, %9 : vector<16x32xf32>
    %11 = arith.mulf %8, %10 : vector<16x32xf32>
    %cst_6 = arith.constant dense<0.000000e+00> : vector<16xf32>
    %12 = vector.multi_reduction <add>, %11, %cst_6 [1] : vector<16x32xf32> to vector<16xf32>
    %13 = vector.shape_cast %12 : vector<16xf32> to vector<16x1xf32>
    %cst_7 = arith.constant 3.200000e+01 : f32
    %14 = vector.broadcast %cst_7 : f32 to vector<16x1xf32>
    %15 = arith.divf %13, %14 : vector<16x1xf32>
    %16 = vector.broadcast %6 : vector<16x1xf32> to vector<16x32xf32>
    %17 = arith.subf %0, %16 : vector<16x32xf32>
    %cst_8 = arith.constant 9.99999996E-13 : f32
    %18 = vector.broadcast %cst_8 : f32 to vector<16x1xf32>
    %19 = arith.addf %15, %18 : vector<16x1xf32>
    %20 = math.rsqrt %19 : vector<16x1xf32>
    %21 = vector.broadcast %20 : vector<16x1xf32> to vector<16x32xf32>
    %22 = arith.mulf %17, %21 : vector<16x32xf32>
    %23 = vector.broadcast %1 : vector<1x32xf32> to vector<16x32xf32>
    %24 = arith.mulf %22, %23 : vector<16x32xf32>
    %25 = vector.broadcast %2 : vector<1x32xf32> to vector<16x32xf32>
    %26 = arith.addf %24, %25 : vector<16x32xf32>
    %c0_9 = arith.constant 0 : index
    %c0_10 = arith.constant 0 : index
    %27 = vector.load %arg1[%c0_9, %c0_10] : memref<2x8xf32, #tpu.memory_space<vmem>>, vector<2x8xf32>
    %28 = vector.shape_cast %27 : vector<2x8xf32> to vector<2x1x8xf32>
    %c0_11 = arith.constant 0 : index
    %c0_12 = arith.constant 0 : index
    %c0_13 = arith.constant 0 : index
    %29 = vector.load %arg4[%c0_11, %c0_12, %c0_13] : memref<2x32x96xf32, #tpu.memory_space<vmem>>, vector<1x32x96xf32>
    %30 = vector.shape_cast %29 : vector<1x32x96xf32> to vector<32x96xf32>
    %cst_14 = arith.constant dense<0.000000e+00> : vector<16x96xf32>
    %31 = tpu.matmul %26, %30, %cst_14 {dimension_numbers = #tpu.dot_dimension_numbers<[1], [0], [0], [1], [0, 0, 1, 1], [], []>} : vector<16x32xf32>, vector<32x96xf32>, vector<16x96xf32> -> vector<16x96xf32>
    %c0_15 = arith.constant 0 : index
    %c0_16 = arith.constant 0 : index
    %c0_17 = arith.constant 0 : index
    %32 = vector.load %arg5[%c0_15, %c0_16, %c0_17] : memref<2x1x96xf32, #tpu.memory_space<vmem>>, vector<1x1x96xf32>
    %33 = vector.shape_cast %32 : vector<1x1x96xf32> to vector<1x96xf32>
    %34 = vector.broadcast %33 : vector<1x96xf32> to vector<16x96xf32>
    %35 = arith.addf %31, %34 : vector<16x96xf32>
    %c0_18 = arith.constant 0 : index
    %c0_19 = arith.constant 0 : index
    %c0_20 = arith.constant 0 : index
    %36 = vector.load %arg6[%c0_18, %c0_19, %c0_20] : memref<2x32x32xf32, #tpu.memory_space<vmem>>, vector<1x32x32xf32>
    %37 = vector.shape_cast %36 : vector<1x32x32xf32> to vector<32x32xf32>
    %38 = vector.extract_strided_slice %35 {offsets = [0, 0], sizes = [16, 16], strides = [1, 1]} : vector<16x96xf32> to vector<16x16xf32>
    %39 = vector.extract_strided_slice %35 {offsets = [0, 32], sizes = [16, 16], strides = [1, 1]} : vector<16x96xf32> to vector<16x16xf32>
    %40 = vector.extract_strided_slice %35 {offsets = [0, 64], sizes = [16, 16], strides = [1, 1]} : vector<16x96xf32> to vector<16x16xf32>
    %41 = vector.shape_cast %38 : vector<16x16xf32> to vector<2x8x16xf32>
    %42 = vector.shape_cast %39 : vector<16x16xf32> to vector<2x8x16xf32>
    %43 = vector.shape_cast %40 : vector<16x16xf32> to vector<2x8x16xf32>
    "tpu.trace_start"() <{level = 10 : i32, message = "bqd,bkd->bqk"}> : () -> ()
    %cst_21 = arith.constant dense<0.000000e+00> : vector<2x8x8xf32>
    %44 = tpu.matmul %41, %42, %cst_21 {dimension_numbers = #tpu.dot_dimension_numbers<[2], [2], [1], [1], [0, 0, 0, 1, 1, 1], [0], [0]>} : vector<2x8x16xf32>, vector<2x8x16xf32>, vector<2x8x8xf32> -> vector<2x8x8xf32>
    "tpu.trace_stop"() : () -> ()
    %cst_22 = arith.constant 2.500000e-01 : f32
    %45 = vector.broadcast %cst_22 : f32 to vector<2x8x8xf32>
    %46 = arith.mulf %44, %45 : vector<2x8x8xf32>
    %47 = vector.broadcast %28 : vector<2x1x8xf32> to vector<2x8x8xf32>
    %48 = arith.addf %46, %47 : vector<2x8x8xf32>
    %cst_23 = arith.constant dense<0xFF800000> : vector<2x8xf32>
    %49 = vector.multi_reduction <maximumf>, %48, %cst_23 [2] : vector<2x8x8xf32> to vector<2x8xf32>
    %50 = vector.shape_cast %49 : vector<2x8xf32> to vector<2x8x1xf32>
    %51 = vector.broadcast %50 : vector<2x8x1xf32> to vector<2x8x8xf32>
    %52 = arith.subf %48, %51 : vector<2x8x8xf32>
    %53 = math.exp %52 : vector<2x8x8xf32>
    %cst_24 = arith.constant dense<0.000000e+00> : vector<2x8xf32>
    %54 = vector.multi_reduction <add>, %53, %cst_24 [2] : vector<2x8x8xf32> to vector<2x8xf32>
    %55 = vector.shape_cast %54 : vector<2x8xf32> to vector<2x8x1xf32>
    %56 = vector.broadcast %55 : vector<2x8x1xf32> to vector<2x8x8xf32>
    %57 = arith.divf %53, %56 : vector<2x8x8xf32>
    "tpu.trace_start"() <{level = 10 : i32, message = "bqk,bkd->bqd"}> : () -> ()
    %cst_25 = arith.constant dense<0.000000e+00> : vector<2x8x16xf32>
    %58 = tpu.matmul %57, %43, %cst_25 {dimension_numbers = #tpu.dot_dimension_numbers<[2], [1], [1], [2], [0, 0, 0, 1, 1, 2], [0], [0]>} : vector<2x8x8xf32>, vector<2x8x16xf32>, vector<2x8x16xf32> -> vector<2x8x16xf32>
    "tpu.trace_stop"() : () -> ()
    %59 = vector.shape_cast %58 : vector<2x8x16xf32> to vector<16x16xf32>
    %60 = vector.extract_strided_slice %37 {offsets = [0, 0], sizes = [16, 32], strides = [1, 1]} : vector<32x32xf32> to vector<16x32xf32>
    %cst_26 = arith.constant dense<0.000000e+00> : vector<16x32xf32>
    %61 = tpu.matmul %59, %60, %cst_26 {dimension_numbers = #tpu.dot_dimension_numbers<[1], [0], [0], [1], [0, 0, 1, 1], [], []>} : vector<16x16xf32>, vector<16x32xf32>, vector<16x32xf32> -> vector<16x32xf32>
    %62 = vector.extract_strided_slice %35 {offsets = [0, 16], sizes = [16, 16], strides = [1, 1]} : vector<16x96xf32> to vector<16x16xf32>
    %63 = vector.extract_strided_slice %35 {offsets = [0, 48], sizes = [16, 16], strides = [1, 1]} : vector<16x96xf32> to vector<16x16xf32>
    %64 = vector.extract_strided_slice %35 {offsets = [0, 80], sizes = [16, 16], strides = [1, 1]} : vector<16x96xf32> to vector<16x16xf32>
    %65 = vector.shape_cast %62 : vector<16x16xf32> to vector<2x8x16xf32>
    %66 = vector.shape_cast %63 : vector<16x16xf32> to vector<2x8x16xf32>
    %67 = vector.shape_cast %64 : vector<16x16xf32> to vector<2x8x16xf32>
    "tpu.trace_start"() <{level = 10 : i32, message = "bqd,bkd->bqk"}> : () -> ()
    %cst_27 = arith.constant dense<0.000000e+00> : vector<2x8x8xf32>
    %68 = tpu.matmul %65, %66, %cst_27 {dimension_numbers = #tpu.dot_dimension_numbers<[2], [2], [1], [1], [0, 0, 0, 1, 1, 1], [0], [0]>} : vector<2x8x16xf32>, vector<2x8x16xf32>, vector<2x8x8xf32> -> vector<2x8x8xf32>
    "tpu.trace_stop"() : () -> ()
    %cst_28 = arith.constant 2.500000e-01 : f32
    %69 = vector.broadcast %cst_28 : f32 to vector<2x8x8xf32>
    %70 = arith.mulf %68, %69 : vector<2x8x8xf32>
    %71 = vector.broadcast %28 : vector<2x1x8xf32> to vector<2x8x8xf32>
    %72 = arith.addf %70, %71 : vector<2x8x8xf32>
    %cst_29 = arith.constant dense<0xFF800000> : vector<2x8xf32>
    %73 = vector.multi_reduction <maximumf>, %72, %cst_29 [2] : vector<2x8x8xf32> to vector<2x8xf32>
    %74 = vector.shape_cast %73 : vector<2x8xf32> to vector<2x8x1xf32>
    %75 = vector.broadcast %74 : vector<2x8x1xf32> to vector<2x8x8xf32>
    %76 = arith.subf %72, %75 : vector<2x8x8xf32>
    %77 = math.exp %76 : vector<2x8x8xf32>
    %cst_30 = arith.constant dense<0.000000e+00> : vector<2x8xf32>
    %78 = vector.multi_reduction <add>, %77, %cst_30 [2] : vector<2x8x8xf32> to vector<2x8xf32>
    %79 = vector.shape_cast %78 : vector<2x8xf32> to vector<2x8x1xf32>
    %80 = vector.broadcast %79 : vector<2x8x1xf32> to vector<2x8x8xf32>
    %81 = arith.divf %77, %80 : vector<2x8x8xf32>
    "tpu.trace_start"() <{level = 10 : i32, message = "bqk,bkd->bqd"}> : () -> ()
    %cst_31 = arith.constant dense<0.000000e+00> : vector<2x8x16xf32>
    %82 = tpu.matmul %81, %67, %cst_31 {dimension_numbers = #tpu.dot_dimension_numbers<[2], [1], [1], [2], [0, 0, 0, 1, 1, 2], [0], [0]>} : vector<2x8x8xf32>, vector<2x8x16xf32>, vector<2x8x16xf32> -> vector<2x8x16xf32>
    "tpu.trace_stop"() : () -> ()
    %83 = vector.shape_cast %82 : vector<2x8x16xf32> to vector<16x16xf32>
    %84 = vector.extract_strided_slice %37 {offsets = [16, 0], sizes = [16, 32], strides = [1, 1]} : vector<32x32xf32> to vector<16x32xf32>
    %cst_32 = arith.constant dense<0.000000e+00> : vector<16x32xf32>
    %85 = tpu.matmul %83, %84, %cst_32 {dimension_numbers = #tpu.dot_dimension_numbers<[1], [0], [0], [1], [0, 0, 1, 1], [], []>} : vector<16x16xf32>, vector<16x32xf32>, vector<16x32xf32> -> vector<16x32xf32>
    %86 = arith.addf %61, %85 : vector<16x32xf32>
    %c0_33 = arith.constant 0 : index
    %c0_34 = arith.constant 0 : index
    %c0_35 = arith.constant 0 : index
    %87 = vector.load %arg7[%c0_33, %c0_34, %c0_35] : memref<2x1x32xf32, #tpu.memory_space<vmem>>, vector<1x1x32xf32>
    %88 = vector.shape_cast %87 : vector<1x1x32xf32> to vector<1x32xf32>
    %89 = vector.broadcast %88 : vector<1x32xf32> to vector<16x32xf32>
    %90 = arith.addf %86, %89 : vector<16x32xf32>
    %91 = arith.addf %90, %26 : vector<16x32xf32>
    %c0_36 = arith.constant 0 : index
    %c0_37 = arith.constant 0 : index
    %c0_38 = arith.constant 0 : index
    %92 = vector.load %arg8[%c0_36, %c0_37, %c0_38] : memref<2x1x32xf32, #tpu.memory_space<vmem>>, vector<1x1x32xf32>
    %93 = vector.shape_cast %92 : vector<1x1x32xf32> to vector<1x32xf32>
    %c0_39 = arith.constant 0 : index
    %c0_40 = arith.constant 0 : index
    %c0_41 = arith.constant 0 : index
    %94 = vector.load %arg9[%c0_39, %c0_40, %c0_41] : memref<2x1x32xf32, #tpu.memory_space<vmem>>, vector<1x1x32xf32>
    %95 = vector.shape_cast %94 : vector<1x1x32xf32> to vector<1x32xf32>
    %cst_42 = arith.constant dense<0.000000e+00> : vector<16xf32>
    %96 = vector.multi_reduction <add>, %91, %cst_42 [1] : vector<16x32xf32> to vector<16xf32>
    %97 = vector.shape_cast %96 : vector<16xf32> to vector<16x1xf32>
    %cst_43 = arith.constant 3.200000e+01 : f32
    %98 = vector.broadcast %cst_43 : f32 to vector<16x1xf32>
    %99 = arith.divf %97, %98 : vector<16x1xf32>
    %100 = vector.broadcast %99 : vector<16x1xf32> to vector<16x32xf32>
    %101 = arith.subf %91, %100 : vector<16x32xf32>
    %102 = vector.broadcast %99 : vector<16x1xf32> to vector<16x32xf32>
    %103 = arith.subf %91, %102 : vector<16x32xf32>
    %104 = arith.mulf %101, %103 : vector<16x32xf32>
    %cst_44 = arith.constant dense<0.000000e+00> : vector<16xf32>
    %105 = vector.multi_reduction <add>, %104, %cst_44 [1] : vector<16x32xf32> to vector<16xf32>
    %106 = vector.shape_cast %105 : vector<16xf32> to vector<16x1xf32>
    %cst_45 = arith.constant 3.200000e+01 : f32
    %107 = vector.broadcast %cst_45 : f32 to vector<16x1xf32>
    %108 = arith.divf %106, %107 : vector<16x1xf32>
    %109 = vector.broadcast %99 : vector<16x1xf32> to vector<16x32xf32>
    %110 = arith.subf %91, %109 : vector<16x32xf32>
    %cst_46 = arith.constant 9.99999996E-13 : f32
    %111 = vector.broadcast %cst_46 : f32 to vector<16x1xf32>
    %112 = arith.addf %108, %111 : vector<16x1xf32>
    %113 = math.rsqrt %112 : vector<16x1xf32>
    %114 = vector.broadcast %113 : vector<16x1xf32> to vector<16x32xf32>
    %115 = arith.mulf %110, %114 : vector<16x32xf32>
    %116 = vector.broadcast %93 : vector<1x32xf32> to vector<16x32xf32>
    %117 = arith.mulf %115, %116 : vector<16x32xf32>
    %118 = vector.broadcast %95 : vector<1x32xf32> to vector<16x32xf32>
    %119 = arith.addf %117, %118 : vector<16x32xf32>
    %c0_47 = arith.constant 0 : index
    %c0_48 = arith.constant 0 : index
    %c0_49 = arith.constant 0 : index
    %120 = vector.load %arg10[%c0_47, %c0_48, %c0_49] : memref<2x32x64xf32, #tpu.memory_space<vmem>>, vector<1x32x64xf32>
    %121 = vector.shape_cast %120 : vector<1x32x64xf32> to vector<32x64xf32>
    %cst_50 = arith.constant dense<0.000000e+00> : vector<16x64xf32>
    %122 = tpu.matmul %119, %121, %cst_50 {dimension_numbers = #tpu.dot_dimension_numbers<[1], [0], [0], [1], [0, 0, 1, 1], [], []>} : vector<16x32xf32>, vector<32x64xf32>, vector<16x64xf32> -> vector<16x64xf32>
    %c0_51 = arith.constant 0 : index
    %c0_52 = arith.constant 0 : index
    %c0_53 = arith.constant 0 : index
    %123 = vector.load %arg11[%c0_51, %c0_52, %c0_53] : memref<2x1x64xf32, #tpu.memory_space<vmem>>, vector<1x1x64xf32>
    %124 = vector.shape_cast %123 : vector<1x1x64xf32> to vector<1x64xf32>
    %125 = vector.broadcast %124 : vector<1x64xf32> to vector<16x64xf32>
    %126 = arith.addf %122, %125 : vector<16x64xf32>
    %cst_54 = arith.constant 5.000000e-01 : f32
    %127 = vector.broadcast %cst_54 : f32 to vector<16x64xf32>
    %128 = arith.mulf %127, %126 : vector<16x64xf32>
    %cst_55 = arith.constant 4.471500e-02 : f32
    %129 = vector.broadcast %cst_55 : f32 to vector<16x64xf32>
    %130 = arith.mulf %129, %126 : vector<16x64xf32>
    %131 = arith.mulf %130, %126 : vector<16x64xf32>
    %132 = arith.mulf %131, %126 : vector<16x64xf32>
    %133 = arith.addf %126, %132 : vector<16x64xf32>
    %cst_56 = arith.constant 0.797884583 : f32
    %134 = vector.broadcast %cst_56 : f32 to vector<16x64xf32>
    %135 = arith.mulf %134, %133 : vector<16x64xf32>
    %136 = math.tanh %135 : vector<16x64xf32>
    %cst_57 = arith.constant 1.000000e+00 : f32
    %137 = vector.broadcast %cst_57 : f32 to vector<16x64xf32>
    %138 = arith.addf %137, %136 : vector<16x64xf32>
    %139 = arith.mulf %128, %138 : vector<16x64xf32>
    %c0_58 = arith.constant 0 : index
    %c0_59 = arith.constant 0 : index
    %c0_60 = arith.constant 0 : index
    %140 = vector.load %arg12[%c0_58, %c0_59, %c0_60] : memref<2x64x32xf32, #tpu.memory_space<vmem>>, vector<1x64x32xf32>
    %141 = vector.shape_cast %140 : vector<1x64x32xf32> to vector<64x32xf32>
    %cst_61 = arith.constant dense<0.000000e+00> : vector<16x32xf32>
    %142 = tpu.matmul %139, %141, %cst_61 {dimension_numbers = #tpu.dot_dimension_numbers<[1], [0], [0], [1], [0, 0, 1, 1], [], []>} : vector<16x64xf32>, vector<64x32xf32>, vector<16x32xf32> -> vector<16x32xf32>
    %c0_62 = arith.constant 0 : index
    %c0_63 = arith.constant 0 : index
    %c0_64 = arith.constant 0 : index
    %143 = vector.load %arg13[%c0_62, %c0_63, %c0_64] : memref<2x1x32xf32, #tpu.memory_space<vmem>>, vector<1x1x32xf32>
    %144 = vector.shape_cast %143 : vector<1x1x32xf32> to vector<1x32xf32>
    %145 = vector.broadcast %144 : vector<1x32xf32> to vector<16x32xf32>
    %146 = arith.addf %142, %145 : vector<16x32xf32>
    %147 = arith.addf %146, %119 : vector<16x32xf32>
    %c0_65 = arith.constant 0 : index
    %c0_66 = arith.constant 0 : index
    %c0_67 = arith.constant 0 : index
    %148 = vector.load %arg14[%c0_65, %c0_66, %c0_67] : memref<2x1x32xf32, #tpu.memory_space<vmem>>, vector<1x1x32xf32>
    %149 = vector.shape_cast %148 : vector<1x1x32xf32> to vector<1x32xf32>
    %c0_68 = arith.constant 0 : index
    %c0_69 = arith.constant 0 : index
    %c0_70 = arith.constant 0 : index
    %150 = vector.load %arg15[%c0_68, %c0_69, %c0_70] : memref<2x1x32xf32, #tpu.memory_space<vmem>>, vector<1x1x32xf32>
    %151 = vector.shape_cast %150 : vector<1x1x32xf32> to vector<1x32xf32>
    %cst_71 = arith.constant dense<0.000000e+00> : vector<16xf32>
    %152 = vector.multi_reduction <add>, %147, %cst_71 [1] : vector<16x32xf32> to vector<16xf32>
    %153 = vector.shape_cast %152 : vector<16xf32> to vector<16x1xf32>
    %cst_72 = arith.constant 3.200000e+01 : f32
    %154 = vector.broadcast %cst_72 : f32 to vector<16x1xf32>
    %155 = arith.divf %153, %154 : vector<16x1xf32>
    %156 = vector.broadcast %155 : vector<16x1xf32> to vector<16x32xf32>
    %157 = arith.subf %147, %156 : vector<16x32xf32>
    %158 = vector.broadcast %155 : vector<16x1xf32> to vector<16x32xf32>
    %159 = arith.subf %147, %158 : vector<16x32xf32>
    %160 = arith.mulf %157, %159 : vector<16x32xf32>
    %cst_73 = arith.constant dense<0.000000e+00> : vector<16xf32>
    %161 = vector.multi_reduction <add>, %160, %cst_73 [1] : vector<16x32xf32> to vector<16xf32>
    %162 = vector.shape_cast %161 : vector<16xf32> to vector<16x1xf32>
    %cst_74 = arith.constant 3.200000e+01 : f32
    %163 = vector.broadcast %cst_74 : f32 to vector<16x1xf32>
    %164 = arith.divf %162, %163 : vector<16x1xf32>
    %165 = vector.broadcast %155 : vector<16x1xf32> to vector<16x32xf32>
    %166 = arith.subf %147, %165 : vector<16x32xf32>
    %cst_75 = arith.constant 9.99999996E-13 : f32
    %167 = vector.broadcast %cst_75 : f32 to vector<16x1xf32>
    %168 = arith.addf %164, %167 : vector<16x1xf32>
    %169 = math.rsqrt %168 : vector<16x1xf32>
    %170 = vector.broadcast %169 : vector<16x1xf32> to vector<16x32xf32>
    %171 = arith.mulf %166, %170 : vector<16x32xf32>
    %172 = vector.broadcast %149 : vector<1x32xf32> to vector<16x32xf32>
    %173 = arith.mulf %171, %172 : vector<16x32xf32>
    %174 = vector.broadcast %151 : vector<1x32xf32> to vector<16x32xf32>
    %175 = arith.addf %173, %174 : vector<16x32xf32>
    %c1 = arith.constant 1 : index
    %c0_76 = arith.constant 0 : index
    %c0_77 = arith.constant 0 : index
    %176 = vector.load %arg4[%c1, %c0_76, %c0_77] : memref<2x32x96xf32, #tpu.memory_space<vmem>>, vector<1x32x96xf32>
    %177 = vector.shape_cast %176 : vector<1x32x96xf32> to vector<32x96xf32>
    %cst_78 = arith.constant dense<0.000000e+00> : vector<16x96xf32>
    %178 = tpu.matmul %175, %177, %cst_78 {dimension_numbers = #tpu.dot_dimension_numbers<[1], [0], [0], [1], [0, 0, 1, 1], [], []>} : vector<16x32xf32>, vector<32x96xf32>, vector<16x96xf32> -> vector<16x96xf32>
    %c1_79 = arith.constant 1 : index
    %c0_80 = arith.constant 0 : index
    %c0_81 = arith.constant 0 : index
    %179 = vector.load %arg5[%c1_79, %c0_80, %c0_81] : memref<2x1x96xf32, #tpu.memory_space<vmem>>, vector<1x1x96xf32>
    %180 = vector.shape_cast %179 : vector<1x1x96xf32> to vector<1x96xf32>
    %181 = vector.broadcast %180 : vector<1x96xf32> to vector<16x96xf32>
    %182 = arith.addf %178, %181 : vector<16x96xf32>
    %c1_82 = arith.constant 1 : index
    %c0_83 = arith.constant 0 : index
    %c0_84 = arith.constant 0 : index
    %183 = vector.load %arg6[%c1_82, %c0_83, %c0_84] : memref<2x32x32xf32, #tpu.memory_space<vmem>>, vector<1x32x32xf32>
    %184 = vector.shape_cast %183 : vector<1x32x32xf32> to vector<32x32xf32>
    %185 = vector.extract_strided_slice %182 {offsets = [0, 0], sizes = [16, 16], strides = [1, 1]} : vector<16x96xf32> to vector<16x16xf32>
    %186 = vector.extract_strided_slice %182 {offsets = [0, 32], sizes = [16, 16], strides = [1, 1]} : vector<16x96xf32> to vector<16x16xf32>
    %187 = vector.extract_strided_slice %182 {offsets = [0, 64], sizes = [16, 16], strides = [1, 1]} : vector<16x96xf32> to vector<16x16xf32>
    %188 = vector.shape_cast %185 : vector<16x16xf32> to vector<2x8x16xf32>
    %189 = vector.shape_cast %186 : vector<16x16xf32> to vector<2x8x16xf32>
    %190 = vector.shape_cast %187 : vector<16x16xf32> to vector<2x8x16xf32>
    "tpu.trace_start"() <{level = 10 : i32, message = "bqd,bkd->bqk"}> : () -> ()
    %cst_85 = arith.constant dense<0.000000e+00> : vector<2x8x8xf32>
    %191 = tpu.matmul %188, %189, %cst_85 {dimension_numbers = #tpu.dot_dimension_numbers<[2], [2], [1], [1], [0, 0, 0, 1, 1, 1], [0], [0]>} : vector<2x8x16xf32>, vector<2x8x16xf32>, vector<2x8x8xf32> -> vector<2x8x8xf32>
    "tpu.trace_stop"() : () -> ()
    %cst_86 = arith.constant 2.500000e-01 : f32
    %192 = vector.broadcast %cst_86 : f32 to vector<2x8x8xf32>
    %193 = arith.mulf %191, %192 : vector<2x8x8xf32>
    %194 = vector.broadcast %28 : vector<2x1x8xf32> to vector<2x8x8xf32>
    %195 = arith.addf %193, %194 : vector<2x8x8xf32>
    %cst_87 = arith.constant dense<0xFF800000> : vector<2x8xf32>
    %196 = vector.multi_reduction <maximumf>, %195, %cst_87 [2] : vector<2x8x8xf32> to vector<2x8xf32>
    %197 = vector.shape_cast %196 : vector<2x8xf32> to vector<2x8x1xf32>
    %198 = vector.broadcast %197 : vector<2x8x1xf32> to vector<2x8x8xf32>
    %199 = arith.subf %195, %198 : vector<2x8x8xf32>
    %200 = math.exp %199 : vector<2x8x8xf32>
    %cst_88 = arith.constant dense<0.000000e+00> : vector<2x8xf32>
    %201 = vector.multi_reduction <add>, %200, %cst_88 [2] : vector<2x8x8xf32> to vector<2x8xf32>
    %202 = vector.shape_cast %201 : vector<2x8xf32> to vector<2x8x1xf32>
    %203 = vector.broadcast %202 : vector<2x8x1xf32> to vector<2x8x8xf32>
    %204 = arith.divf %200, %203 : vector<2x8x8xf32>
    "tpu.trace_start"() <{level = 10 : i32, message = "bqk,bkd->bqd"}> : () -> ()
    %cst_89 = arith.constant dense<0.000000e+00> : vector<2x8x16xf32>
    %205 = tpu.matmul %204, %190, %cst_89 {dimension_numbers = #tpu.dot_dimension_numbers<[2], [1], [1], [2], [0, 0, 0, 1, 1, 2], [0], [0]>} : vector<2x8x8xf32>, vector<2x8x16xf32>, vector<2x8x16xf32> -> vector<2x8x16xf32>
    "tpu.trace_stop"() : () -> ()
    %206 = vector.shape_cast %205 : vector<2x8x16xf32> to vector<16x16xf32>
    %207 = vector.extract_strided_slice %184 {offsets = [0, 0], sizes = [16, 32], strides = [1, 1]} : vector<32x32xf32> to vector<16x32xf32>
    %cst_90 = arith.constant dense<0.000000e+00> : vector<16x32xf32>
    %208 = tpu.matmul %206, %207, %cst_90 {dimension_numbers = #tpu.dot_dimension_numbers<[1], [0], [0], [1], [0, 0, 1, 1], [], []>} : vector<16x16xf32>, vector<16x32xf32>, vector<16x32xf32> -> vector<16x32xf32>
    %209 = vector.extract_strided_slice %182 {offsets = [0, 16], sizes = [16, 16], strides = [1, 1]} : vector<16x96xf32> to vector<16x16xf32>
    %210 = vector.extract_strided_slice %182 {offsets = [0, 48], sizes = [16, 16], strides = [1, 1]} : vector<16x96xf32> to vector<16x16xf32>
    %211 = vector.extract_strided_slice %182 {offsets = [0, 80], sizes = [16, 16], strides = [1, 1]} : vector<16x96xf32> to vector<16x16xf32>
    %212 = vector.shape_cast %209 : vector<16x16xf32> to vector<2x8x16xf32>
    %213 = vector.shape_cast %210 : vector<16x16xf32> to vector<2x8x16xf32>
    %214 = vector.shape_cast %211 : vector<16x16xf32> to vector<2x8x16xf32>
    "tpu.trace_start"() <{level = 10 : i32, message = "bqd,bkd->bqk"}> : () -> ()
    %cst_91 = arith.constant dense<0.000000e+00> : vector<2x8x8xf32>
    %215 = tpu.matmul %212, %213, %cst_91 {dimension_numbers = #tpu.dot_dimension_numbers<[2], [2], [1], [1], [0, 0, 0, 1, 1, 1], [0], [0]>} : vector<2x8x16xf32>, vector<2x8x16xf32>, vector<2x8x8xf32> -> vector<2x8x8xf32>
    "tpu.trace_stop"() : () -> ()
    %cst_92 = arith.constant 2.500000e-01 : f32
    %216 = vector.broadcast %cst_92 : f32 to vector<2x8x8xf32>
    %217 = arith.mulf %215, %216 : vector<2x8x8xf32>
    %218 = vector.broadcast %28 : vector<2x1x8xf32> to vector<2x8x8xf32>
    %219 = arith.addf %217, %218 : vector<2x8x8xf32>
    %cst_93 = arith.constant dense<0xFF800000> : vector<2x8xf32>
    %220 = vector.multi_reduction <maximumf>, %219, %cst_93 [2] : vector<2x8x8xf32> to vector<2x8xf32>
    %221 = vector.shape_cast %220 : vector<2x8xf32> to vector<2x8x1xf32>
    %222 = vector.broadcast %221 : vector<2x8x1xf32> to vector<2x8x8xf32>
    %223 = arith.subf %219, %222 : vector<2x8x8xf32>
    %224 = math.exp %223 : vector<2x8x8xf32>
    %cst_94 = arith.constant dense<0.000000e+00> : vector<2x8xf32>
    %225 = vector.multi_reduction <add>, %224, %cst_94 [2] : vector<2x8x8xf32> to vector<2x8xf32>
    %226 = vector.shape_cast %225 : vector<2x8xf32> to vector<2x8x1xf32>
    %227 = vector.broadcast %226 : vector<2x8x1xf32> to vector<2x8x8xf32>
    %228 = arith.divf %224, %227 : vector<2x8x8xf32>
    "tpu.trace_start"() <{level = 10 : i32, message = "bqk,bkd->bqd"}> : () -> ()
    %cst_95 = arith.constant dense<0.000000e+00> : vector<2x8x16xf32>
    %229 = tpu.matmul %228, %214, %cst_95 {dimension_numbers = #tpu.dot_dimension_numbers<[2], [1], [1], [2], [0, 0, 0, 1, 1, 2], [0], [0]>} : vector<2x8x8xf32>, vector<2x8x16xf32>, vector<2x8x16xf32> -> vector<2x8x16xf32>
    "tpu.trace_stop"() : () -> ()
    %230 = vector.shape_cast %229 : vector<2x8x16xf32> to vector<16x16xf32>
    %231 = vector.extract_strided_slice %184 {offsets = [16, 0], sizes = [16, 32], strides = [1, 1]} : vector<32x32xf32> to vector<16x32xf32>
    %cst_96 = arith.constant dense<0.000000e+00> : vector<16x32xf32>
    %232 = tpu.matmul %230, %231, %cst_96 {dimension_numbers = #tpu.dot_dimension_numbers<[1], [0], [0], [1], [0, 0, 1, 1], [], []>} : vector<16x16xf32>, vector<16x32xf32>, vector<16x32xf32> -> vector<16x32xf32>
    %233 = arith.addf %208, %232 : vector<16x32xf32>
    %c1_97 = arith.constant 1 : index
    %c0_98 = arith.constant 0 : index
    %c0_99 = arith.constant 0 : index
    %234 = vector.load %arg7[%c1_97, %c0_98, %c0_99] : memref<2x1x32xf32, #tpu.memory_space<vmem>>, vector<1x1x32xf32>
    %235 = vector.shape_cast %234 : vector<1x1x32xf32> to vector<1x32xf32>
    %236 = vector.broadcast %235 : vector<1x32xf32> to vector<16x32xf32>
    %237 = arith.addf %233, %236 : vector<16x32xf32>
    %238 = arith.addf %237, %175 : vector<16x32xf32>
    %c1_100 = arith.constant 1 : index
    %c0_101 = arith.constant 0 : index
    %c0_102 = arith.constant 0 : index
    %239 = vector.load %arg8[%c1_100, %c0_101, %c0_102] : memref<2x1x32xf32, #tpu.memory_space<vmem>>, vector<1x1x32xf32>
    %240 = vector.shape_cast %239 : vector<1x1x32xf32> to vector<1x32xf32>
    %c1_103 = arith.constant 1 : index
    %c0_104 = arith.constant 0 : index
    %c0_105 = arith.constant 0 : index
    %241 = vector.load %arg9[%c1_103, %c0_104, %c0_105] : memref<2x1x32xf32, #tpu.memory_space<vmem>>, vector<1x1x32xf32>
    %242 = vector.shape_cast %241 : vector<1x1x32xf32> to vector<1x32xf32>
    %cst_106 = arith.constant dense<0.000000e+00> : vector<16xf32>
    %243 = vector.multi_reduction <add>, %238, %cst_106 [1] : vector<16x32xf32> to vector<16xf32>
    %244 = vector.shape_cast %243 : vector<16xf32> to vector<16x1xf32>
    %cst_107 = arith.constant 3.200000e+01 : f32
    %245 = vector.broadcast %cst_107 : f32 to vector<16x1xf32>
    %246 = arith.divf %244, %245 : vector<16x1xf32>
    %247 = vector.broadcast %246 : vector<16x1xf32> to vector<16x32xf32>
    %248 = arith.subf %238, %247 : vector<16x32xf32>
    %249 = vector.broadcast %246 : vector<16x1xf32> to vector<16x32xf32>
    %250 = arith.subf %238, %249 : vector<16x32xf32>
    %251 = arith.mulf %248, %250 : vector<16x32xf32>
    %cst_108 = arith.constant dense<0.000000e+00> : vector<16xf32>
    %252 = vector.multi_reduction <add>, %251, %cst_108 [1] : vector<16x32xf32> to vector<16xf32>
    %253 = vector.shape_cast %252 : vector<16xf32> to vector<16x1xf32>
    %cst_109 = arith.constant 3.200000e+01 : f32
    %254 = vector.broadcast %cst_109 : f32 to vector<16x1xf32>
    %255 = arith.divf %253, %254 : vector<16x1xf32>
    %256 = vector.broadcast %246 : vector<16x1xf32> to vector<16x32xf32>
    %257 = arith.subf %238, %256 : vector<16x32xf32>
    %cst_110 = arith.constant 9.99999996E-13 : f32
    %258 = vector.broadcast %cst_110 : f32 to vector<16x1xf32>
    %259 = arith.addf %255, %258 : vector<16x1xf32>
    %260 = math.rsqrt %259 : vector<16x1xf32>
    %261 = vector.broadcast %260 : vector<16x1xf32> to vector<16x32xf32>
    %262 = arith.mulf %257, %261 : vector<16x32xf32>
    %263 = vector.broadcast %240 : vector<1x32xf32> to vector<16x32xf32>
    %264 = arith.mulf %262, %263 : vector<16x32xf32>
    %265 = vector.broadcast %242 : vector<1x32xf32> to vector<16x32xf32>
    %266 = arith.addf %264, %265 : vector<16x32xf32>
    %c1_111 = arith.constant 1 : index
    %c0_112 = arith.constant 0 : index
    %c0_113 = arith.constant 0 : index
    %267 = vector.load %arg10[%c1_111, %c0_112, %c0_113] : memref<2x32x64xf32, #tpu.memory_space<vmem>>, vector<1x32x64xf32>
    %268 = vector.shape_cast %267 : vector<1x32x64xf32> to vector<32x64xf32>
    %cst_114 = arith.constant dense<0.000000e+00> : vector<16x64xf32>
    %269 = tpu.matmul %266, %268, %cst_114 {dimension_numbers = #tpu.dot_dimension_numbers<[1], [0], [0], [1], [0, 0, 1, 1], [], []>} : vector<16x32xf32>, vector<32x64xf32>, vector<16x64xf32> -> vector<16x64xf32>
    %c1_115 = arith.constant 1 : index
    %c0_116 = arith.constant 0 : index
    %c0_117 = arith.constant 0 : index
    %270 = vector.load %arg11[%c1_115, %c0_116, %c0_117] : memref<2x1x64xf32, #tpu.memory_space<vmem>>, vector<1x1x64xf32>
    %271 = vector.shape_cast %270 : vector<1x1x64xf32> to vector<1x64xf32>
    %272 = vector.broadcast %271 : vector<1x64xf32> to vector<16x64xf32>
    %273 = arith.addf %269, %272 : vector<16x64xf32>
    %cst_118 = arith.constant 5.000000e-01 : f32
    %274 = vector.broadcast %cst_118 : f32 to vector<16x64xf32>
    %275 = arith.mulf %274, %273 : vector<16x64xf32>
    %cst_119 = arith.constant 4.471500e-02 : f32
    %276 = vector.broadcast %cst_119 : f32 to vector<16x64xf32>
    %277 = arith.mulf %276, %273 : vector<16x64xf32>
    %278 = arith.mulf %277, %273 : vector<16x64xf32>
    %279 = arith.mulf %278, %273 : vector<16x64xf32>
    %280 = arith.addf %273, %279 : vector<16x64xf32>
    %cst_120 = arith.constant 0.797884583 : f32
    %281 = vector.broadcast %cst_120 : f32 to vector<16x64xf32>
    %282 = arith.mulf %281, %280 : vector<16x64xf32>
    %283 = math.tanh %282 : vector<16x64xf32>
    %cst_121 = arith.constant 1.000000e+00 : f32
    %284 = vector.broadcast %cst_121 : f32 to vector<16x64xf32>
    %285 = arith.addf %284, %283 : vector<16x64xf32>
    %286 = arith.mulf %275, %285 : vector<16x64xf32>
    %c1_122 = arith.constant 1 : index
    %c0_123 = arith.constant 0 : index
    %c0_124 = arith.constant 0 : index
    %287 = vector.load %arg12[%c1_122, %c0_123, %c0_124] : memref<2x64x32xf32, #tpu.memory_space<vmem>>, vector<1x64x32xf32>
    %288 = vector.shape_cast %287 : vector<1x64x32xf32> to vector<64x32xf32>
    %cst_125 = arith.constant dense<0.000000e+00> : vector<16x32xf32>
    %289 = tpu.matmul %286, %288, %cst_125 {dimension_numbers = #tpu.dot_dimension_numbers<[1], [0], [0], [1], [0, 0, 1, 1], [], []>} : vector<16x64xf32>, vector<64x32xf32>, vector<16x32xf32> -> vector<16x32xf32>
    %c1_126 = arith.constant 1 : index
    %c0_127 = arith.constant 0 : index
    %c0_128 = arith.constant 0 : index
    %290 = vector.load %arg13[%c1_126, %c0_127, %c0_128] : memref<2x1x32xf32, #tpu.memory_space<vmem>>, vector<1x1x32xf32>
    %291 = vector.shape_cast %290 : vector<1x1x32xf32> to vector<1x32xf32>
    %292 = vector.broadcast %291 : vector<1x32xf32> to vector<16x32xf32>
    %293 = arith.addf %289, %292 : vector<16x32xf32>
    %294 = arith.addf %293, %266 : vector<16x32xf32>
    %c1_129 = arith.constant 1 : index
    %c0_130 = arith.constant 0 : index
    %c0_131 = arith.constant 0 : index
    %295 = vector.load %arg14[%c1_129, %c0_130, %c0_131] : memref<2x1x32xf32, #tpu.memory_space<vmem>>, vector<1x1x32xf32>
    %296 = vector.shape_cast %295 : vector<1x1x32xf32> to vector<1x32xf32>
    %c1_132 = arith.constant 1 : index
    %c0_133 = arith.constant 0 : index
    %c0_134 = arith.constant 0 : index
    %297 = vector.load %arg15[%c1_132, %c0_133, %c0_134] : memref<2x1x32xf32, #tpu.memory_space<vmem>>, vector<1x1x32xf32>
    %298 = vector.shape_cast %297 : vector<1x1x32xf32> to vector<1x32xf32>
    %cst_135 = arith.constant dense<0.000000e+00> : vector<16xf32>
    %299 = vector.multi_reduction <add>, %294, %cst_135 [1] : vector<16x32xf32> to vector<16xf32>
    %300 = vector.shape_cast %299 : vector<16xf32> to vector<16x1xf32>
    %cst_136 = arith.constant 3.200000e+01 : f32
    %301 = vector.broadcast %cst_136 : f32 to vector<16x1xf32>
    %302 = arith.divf %300, %301 : vector<16x1xf32>
    %303 = vector.broadcast %302 : vector<16x1xf32> to vector<16x32xf32>
    %304 = arith.subf %294, %303 : vector<16x32xf32>
    %305 = vector.broadcast %302 : vector<16x1xf32> to vector<16x32xf32>
    %306 = arith.subf %294, %305 : vector<16x32xf32>
    %307 = arith.mulf %304, %306 : vector<16x32xf32>
    %cst_137 = arith.constant dense<0.000000e+00> : vector<16xf32>
    %308 = vector.multi_reduction <add>, %307, %cst_137 [1] : vector<16x32xf32> to vector<16xf32>
    %309 = vector.shape_cast %308 : vector<16xf32> to vector<16x1xf32>
    %cst_138 = arith.constant 3.200000e+01 : f32
    %310 = vector.broadcast %cst_138 : f32 to vector<16x1xf32>
    %311 = arith.divf %309, %310 : vector<16x1xf32>
    %312 = vector.broadcast %302 : vector<16x1xf32> to vector<16x32xf32>
    %313 = arith.subf %294, %312 : vector<16x32xf32>
    %cst_139 = arith.constant 9.99999996E-13 : f32
    %314 = vector.broadcast %cst_139 : f32 to vector<16x1xf32>
    %315 = arith.addf %311, %314 : vector<16x1xf32>
    %316 = math.rsqrt %315 : vector<16x1xf32>
    %317 = vector.broadcast %316 : vector<16x1xf32> to vector<16x32xf32>
    %318 = arith.mulf %313, %317 : vector<16x32xf32>
    %319 = vector.broadcast %296 : vector<1x32xf32> to vector<16x32xf32>
    %320 = arith.mulf %318, %319 : vector<16x32xf32>
    %321 = vector.broadcast %298 : vector<1x32xf32> to vector<16x32xf32>
    %322 = arith.addf %320, %321 : vector<16x32xf32>
    %323 = tpu.iota {dimensions = array<i32: 0>} : vector<2x16xi32>
    %324 = tpu.iota {dimensions = array<i32: 1>} : vector<2x16xi32>
    %c8_i32 = arith.constant 8 : i32
    %325 = vector.broadcast %c8_i32 : i32 to vector<2x16xi32>
    %326 = arith.muli %323, %325 : vector<2x16xi32>
    %327 = arith.cmpi eq, %324, %326 : vector<2x16xi32>
    %328 = arith.extui %327 : vector<2x16xi1> to vector<2x16xi32>
    %329 = arith.sitofp %328 : vector<2x16xi32> to vector<2x16xf32>
    %cst_140 = arith.constant dense<0.000000e+00> : vector<2x32xf32>
    %330 = tpu.matmul %329, %322, %cst_140 {dimension_numbers = #tpu.dot_dimension_numbers<[1], [0], [0], [1], [0, 0, 1, 1], [], []>} : vector<2x16xf32>, vector<16x32xf32>, vector<2x32xf32> -> vector<2x32xf32>
    %c0_141 = arith.constant 0 : index
    %c0_142 = arith.constant 0 : index
    %331 = vector.load %arg16[%c0_141, %c0_142] : memref<32x4xf32, #tpu.memory_space<vmem>>, vector<32x4xf32>
    %cst_143 = arith.constant dense<0.000000e+00> : vector<2x4xf32>
    %332 = tpu.matmul %330, %331, %cst_143 {dimension_numbers = #tpu.dot_dimension_numbers<[1], [0], [0], [1], [0, 0, 1, 1], [], []>} : vector<2x32xf32>, vector<32x4xf32>, vector<2x4xf32> -> vector<2x4xf32>
    %c0_144 = arith.constant 0 : index
    %c0_145 = arith.constant 0 : index
    %333 = vector.load %arg17[%c0_144, %c0_145] : memref<1x4xf32, #tpu.memory_space<vmem>>, vector<1x4xf32>
    %334 = vector.broadcast %333 : vector<1x4xf32> to vector<2x4xf32>
    %335 = arith.addf %332, %334 : vector<2x4xf32>
    %c0_146 = arith.constant 0 : index
    %c0_147 = arith.constant 0 : index
    %336 = vector.load %arg18[%c0_146, %c0_147] : memref<2x4xf32, #tpu.memory_space<vmem>>, vector<2x4xf32>
    tpu.vector_store %arg18[%c0_146, %c0_147], %335 {strides = array<i32>} : memref<2x4xf32, #tpu.memory_space<vmem>>, vector<2x4xf32>,
    return
  }
}

</mosaic_0001>

<bundles_post_ra>
// kernel: base_model_forward.1
= control target key start
LH: loop header
LB: loop body
LE: loop exit
PB: predicated region body
PF: predicated region fallthrough
CT: control target
= control target key end

     0   :  { %s3930_s0 = inlined_call_operand.vmem [shape: f32[16,32], index: 0, kind: input, shape index: {}]   ;;  %s3931_s1 = inlined_call_operand.vmem [shape: f32[2,8], index: 1, kind: input, shape index: {}]   ;;  %s3932_s2 = inlined_call_operand.vmem [shape: f32[1,32], index: 2, kind: input, shape index: {}]   ;;  %s3933_s3 = inlined_call_operand.vmem [shape: f32[1,32], index: 3, kind: input, shape index: {}]   ;;  %s3934_s4 = inlined_call_operand.vmem [shape: f32[2,32,96], index: 4, kind: input, shape index: {}]   ;;  %s3935_s5 = inlined_call_operand.vmem [shape: f32[2,1,96], index: 5, kind: input, shape index: {}]   ;;  %s3936_s6 = inlined_call_operand.vmem [shape: f32[2,32,32], index: 6, kind: input, shape index: {}]   ;;  %s3937_s7 = inlined_call_operand.vmem [shape: f32[2,1,32], index: 7, kind: input, shape index: {}]   ;;  %s3938_s8 = inlined_call_operand.vmem [shape: f32[2,1,32], index: 8, kind: input, shape index: {}]   ;;  %s3939_s9 = inlined_call_operand.vmem [shape: f32[2,1,32], index: 9, kind: input, shape index: {}]   ;;  %s3940_s10 = inlined_call_operand.vmem [shape: f32[2,32,64], index: 10, kind: input, shape index: {}]   ;;  %s3941_s11 = inlined_call_operand.vmem [shape: f32[2,1,64], index: 11, kind: input, shape index: {}]   ;;  %s3942_s12 = inlined_call_operand.vmem [shape: f32[2,64,32], index: 12, kind: input, shape index: {}]   ;;  %s3943_s13 = inlined_call_operand.vmem [shape: f32[2,1,32], index: 13, kind: input, shape index: {}]   ;;  %s3944_s14 = inlined_call_operand.vmem [shape: f32[2,1,32], index: 14, kind: input, shape index: {}]   ;;  %s3945_s15 = inlined_call_operand.vmem [shape: f32[2,1,32], index: 15, kind: input, shape index: {}]   ;;  %s3946_s16 = inlined_call_operand.vmem [shape: f32[32,4], index: 16, kind: input, shape index: {}]   ;;  %s3947_s17 = inlined_call_operand.vmem [shape: f32[1,4], index: 17, kind: input, shape index: {}]   ;;  %s3948_s18 = inlined_call_operand.hbm [shape: f32[2,4], index: 18, kind: output, shape index: {}]  }
   0x1   :  { %3950 = sst [smem:[#allocation5_spill]] %s3930_s0 }
   0x2   :  { %3951 = sst [smem:[#allocation6_spill]] %s3931_s1 }
   0x3   :  { %3952 = sst [smem:[#allocation7_spill]] %s3932_s2 }
   0x4   :  { %s3953_s29 = sld [smem:[#allocation5_spill]]  ;;  %vm64_vm0 = vcmask 261120  }
   0xa   :  { %v60_v0 = vld [vmem:[%s3953_s29] sm:$0xff]  ;;  %v61_v1 = vld [vmem:[%s3953_s29 + $0x8] sm:$0xff] }
   0xb   :  { %23 = vsyncpa [#allocation3], 0  ;;  %v65_v2 = vsel %vm64_vm0, %v60_v0, 0.0  ;;  %v68_v3 = vsel %vm64_vm0, %v61_v1, 0.0  ;;  %v132_v14 = vld [vmem:[%s3934_s4] sm:$0xff]  ;;  %v133_v15 = vld [vmem:[%s3934_s4 + $0x8] sm:$0xff]  ;;  %v121_v46 = vlaneseq }
   0xc   :  { %66 = vadd.xlane.f32.xlu0 %v65_v2  ;;  %v134_v16 = vld [vmem:[%s3934_s4 + $0x10] sm:$0xff]  ;;  %v3203_v17 = vpack.c.bf16 %v133_v15, %v132_v14  ;;  %v135_v18 = vld [vmem:[%s3934_s4 + $0x18] sm:$0xff]  ;;  %s3954_s27 = sld [smem:[#allocation7_spill]]  ;;  %v2801_v29 = vld [vmem:[%s3933_s3] ss:$0 sm:$0xff]  ;;  %v3390_v36 = vmov 0.0  }
   0xd   :  { %v3207_v19 = vpack.c.bf16 %v135_v18, %v134_v16  ;;  %3006 = vmatprep.subr.mxu1 %v3390_v36  ;;  %vm3391_vm1 = vmmov 0   ;;  %v2803_v37 = vld [vmem:[%s3935_s5] ss:$0 sm:$0xff]  ;;  %s3392_s0 = smov 96   ;;  %vm231_vm2 = vcmask 130048   ;;  %v3561_v48 = vshrl.u32 %v121_v46, 7 }
   0xe   :  { %3204 = vmatprep.subr.bf16.mxu0 %v3203_v17  ;;  %3008 = vmatprep.mubr.msk.f32.mxu1 %vm3391_vm1, %v3390_v36  ;;  %v3393_v44 = vmov 1966171168   ;;  %s3955_s20 = sld [smem:[#allocation6_spill]]  ;;  %vm397_vm3 = vcmask 64512   ;;  %s3394_s21 = smov 64   ;;  %vm1248_vm4 = vcmask 523264  }
   0xf   :  { %3206 = vmatpush3.bf16.msra.mxu0 %v3203_v17  ;;  %v119_v45 = vunpack.c.l.s4 %v3393_v44  ;;  %v387_v52 = vsub.s32 0, %v3561_v48  ;;  %s3395_s22 = smov 80   ;;  %s3396_s2 = smov 112   ;;  %vm2784_vm6 = vcmask 25600  }
  0x10   :  { %69 = vadd.xlane.f32.xlu0 %v68_v3  ;;  %3208 = vmatprep.subr.bf16.mxu0 %v3207_v19  ;;  %s3397_s23 = smov 48  }
  0x11   :  { %v120_v47 = vunpack.c.0.s8 %v119_v45 }
  0x12   :  { %v2800_v27 = vld [vmem:[%s3954_s27] ss:$0 sm:$0xff] }
  0x13   :  { %3210 = vmatpush3.bf16.msra.mxu0 %v3207_v19  ;;  %v123_v49 = vsub.s32 %v120_v47, %v3561_v48 }
  0x14   :  { %3016 = vmatprep.subr.mxu0 %v3390_v36  ;;  %v2802_v50 = vld.sshfl [vmem:[%s3955_s20] sm:$0x11 pattern:$0x75316420] }
  0x15   :  { %v124_v51 = vrot.slane %v2802_v50, %v123_v49  ;;  %v117_v53 = vcombine.high %v2802_v50, %v2802_v50 }
  0x17   :  { %v3568_v54 = vrot.slane %v124_v51, %v387_v52  ;;  %v131_v55 = vrot.slane %v117_v53, %v123_v49 }
  0x19   :  { %v3571_v60 = vrot.slane %v131_v55, %v387_v52 }
  0x99   :  { %v67_v4 = vpop.xlane.xlu0 %66 }
  0x9a   :  { %v72_v5 = vmul.f32 0.03125, %v67_v4 }
  0x9c   :  { %v74_v6 = vsub.f32 %v60_v0, %v72_v5 }
  0x9d   :  { %v70_v7 = vpop.xlane.xlu0 %69 }
  0x9e   :  { %v73_v8 = vmul.f32 0.03125, %v70_v7  ;;  %v76_v9 = vmul.f32 %v74_v6, %v74_v6 }
  0xa0   :  { %v75_v10 = vsub.f32 %v61_v1, %v73_v8  ;;  %v78_v11 = vsel %vm64_vm0, %v76_v9, 0.0 }
  0xa1   :  { %79 = vadd.xlane.f32.xlu1 %v78_v11 }
  0xa2   :  { %v77_v12 = vmul.f32 %v75_v10, %v75_v10 }
  0xa4   :  { %v81_v13 = vsel %vm64_vm0, %v77_v12, 0.0 }
  0xa5   :  { %82 = vadd.xlane.f32.xlu1 %v81_v13 }
 0x12e   :  { %v80_v20 = vpop.xlane.xlu1 %79 }
 0x12f   :  { %v84_v21 = vmul.f32 0.03125, %v80_v20 }
 0x131   :  { %v86_v22 = vadd.f32 1e-12, %v84_v21 }
 0x132   :  { %v83_v23 = vpop.xlane.xlu1 %82 }
 0x133   :  { %3306 = vrsqrt.f32 %v86_v22  ;;  %v85_v24 = vmul.f32 0.03125, %v83_v23 }
 0x135   :  { %v87_v25 = vadd.f32 1e-12, %v85_v24 }
 0x137   :  { %3308 = vrsqrt.f32 %v87_v25 }
 0x13d   :  { %v3307_v26 = vpop.eup %3306 }
 0x13e   :  { %v90_v28 = vmul.f32 %v3307_v26, %v74_v6 }
 0x140   :  { %v98_v30 = vmul.f32 %v2800_v27, %v90_v28 }
 0x141   :  { %v3309_v31 = vpop.eup %3308 }
 0x142   :  { %v91_v32 = vmul.f32 %v3309_v31, %v75_v10  ;;  %v3523_v33 = vadd.f32 %v2801_v29, %v98_v30 }
 0x144   :  { %v99_v34 = vmul.f32 %v2800_v27, %v91_v32  ;;  %3003 = vmatprep.mubr.msk.f32.mxu0 %vm64_vm0, %v3523_v33 }
 0x146   :  { %v3527_v35 = vadd.f32 %v2801_v29, %v99_v34 }
 0x148   :  { %3004 = vmatmul.mubr.msk.f32.vlgmr.msra.gmra.mrb[0].mxu0 %vm64_vm0, %v3527_v35 }
 0x149   :  { %3018 = vmatprep.mubr.msk.f32.mxu0 %vm3391_vm1, %v3390_v36 }
 0x21b   :  { %v3005_v38 = vpop.f32.mrb[0].mxu0 }
 0x21c   :  { %v3540_v39 = vadd.f32 %v3005_v38, %v2803_v37  ;;  %v215_v40 = vpop.f32.mrb[1].mxu0 }
 0x21d   :  { %v3542_v41 = vadd.f32 %v2803_v37, %v215_v40 }
 0x21e   :  { %307 = vrot.lane.b32.xlu1 %v3540_v39, %s3392_s0 }
 0x21f   :  { %229 = vrot.lane.b32.xlu0 %v3542_v41, %s3392_s0 }
 0x290   :  { %v308_v43 = vpop.permute.xlu1 %307 }
 0x291   :  { %v230_v42 = vpop.permute.xlu0 %229 }
 0x292   :  { %3007 = vmatpush3.xpose.msk.msra.mxu1 %vm231_vm2, %v230_v42 }
 0x293   :  { %3011 = vmatprep.subr.mxu1 %v3390_v36 }
 0x295   :  { %3009 = vmatmul.mubr.msk.f32.vlgmr.msra.gmra.mrb[0].mxu1 %vm231_vm2, %v3542_v41 }
 0x296   :  { %3012 = vmatpush3.xpose.msk.msra.mxu1 %vm231_vm2, %v308_v43  ;;  %3013 = vmatprep.mubr.msk.f32.mxu1 %vm3391_vm1, %v3390_v36 }
 0x297   :  { %3021 = vmatprep.subr.mxu1 %v3390_v36 }
 0x299   :  { %3014 = vmatmul.mubr.msk.f32.vlgmr.msra.gmra.mrb[2].mxu1 %vm231_vm2, %v3540_v39 }
 0x29a   :  { %3023 = vmatprep.mubr.msk.f32.mxu1 %vm3391_vm1, %v3390_v36 }
 0x368   :  { %v302_v56 = vpop.f32.mrb[0].mxu1 }
 0x369   :  { %v383_v57 = vmul.f32 0.25, %v302_v56  ;;  %v3010_v58 = vpop.f32.mrb[1].mxu1 }
 0x36b   :  { %v395_v59 = vadd.f32 %v3568_v54, %v383_v57 }
 0x36c   :  { %v379_v61 = vpop.f32.mrb[2].mxu1 }
 0x36d   :  { %v384_v62 = vmul.f32 0.25, %v379_v61  ;;  %v3015_v63 = vpop.f32.mrb[3].mxu1  ;;  %v398_v0 = vsel %vm397_vm3, %v395_v59, -inf }
 0x36e   :  { %399 = vmax.xlane.f32.xlu1 %v398_v0 }
 0x36f   :  { %v396_v1 = vadd.f32 %v3571_v60, %v384_v62 }
 0x371   :  { %v401_v2 = vsel %vm397_vm3, %v396_v1, -inf }
 0x372   :  { %402 = vmax.xlane.f32.xlu0 %v401_v2 }
 0x37f   :  { %496 = vrot.lane.b32.xlu1 %v3540_v39, %s3394_s21 }
 0x383   :  { %574 = vrot.lane.b32.xlu1 %v3542_v41, %s3395_s22 }
 0x387   :  { %652 = vrot.lane.b32.xlu1 %v3540_v39, %s3395_s22 }
 0x388   :  { %420 = vrot.lane.b32.xlu0 %v3542_v41, %s3394_s21 }
 0x3fb   :  { %v400_v3 = vpop.xlane.xlu1 %399 }
 0x3fc   :  { %v404_v4 = vsub.f32 %v395_v59, %v400_v3  ;;  %v224_v3 = vld [vmem:[%s3936_s6] sm:$0xff] }
 0x3fe   :  { %v406_v5 = vmul.f32 1.442695, %v404_v4  ;;  %v225_v4 = vld [vmem:[%s3936_s6 + $0x8] sm:$0xff] }
 0x3ff   :  { %v497_v6 = vpop.permute.xlu1 %496  ;;  %v403_v7 = vpop.xlane.xlu0 %402 }
 0x400   :  { %3310 = vpow2.f32 %v406_v5  ;;  %v405_v8 = vsub.f32 %v396_v1, %v403_v7  ;;  %3022 = vmatpush3.msra.mxu1 %v497_v6  ;;  %v226_v1 = vld [vmem:[%s3936_s6 + $0x10] sm:$0xff]  ;;  %v3215_v5 = vpack.c.bf16 %v225_v4, %v224_v3  ;;  %v2825_v4 = vld [vmem:[%s3941_s11] ss:$0 sm:$0xff] }
 0x401   :  { %3031 = vmatprep.subr.mxu1 %v3390_v36 }
 0x402   :  { %v408_v9 = vmul.f32 1.442695, %v405_v8 }
 0x403   :  { %v421_v10 = vpop.permute.xlu0 %420  ;;  %v575_v15 = vpop.permute.xlu1 %574 }
 0x404   :  { %3312 = vpow2.f32 %v408_v9  ;;  %3017 = vmatpush3.msra.mxu0 %v421_v10  ;;  %v2822_v10 = vld [vmem:[%s3937_s7] ss:$0 sm:$0xff] }
 0x405   :  { %3026 = vmatprep.subr.mxu0 %v3390_v36 }
 0x407   :  { %v653_v16 = vpop.permute.xlu1 %652 }
 0x40a   :  { %v3311_v11 = vpop.eup %3310 }
 0x40b   :  { %v410_v12 = vsel %vm397_vm3, %v3311_v11, 0.0 }
 0x40c   :  { %411 = vadd.xlane.f32.xlu0 %v410_v12 }
 0x40e   :  { %v3313_v13 = vpop.eup %3312 }
 0x40f   :  { %v413_v14 = vsel %vm397_vm3, %v3313_v13, 0.0 }
 0x410   :  { %414 = vadd.xlane.f32.xlu1 %v413_v14 }
 0x421   :  { %650 = vrot.lane.b32.xlu1 %v3540_v39, %s3396_s2 }
 0x422   :  { %572 = vrot.lane.b32.xlu0 %v3542_v41, %s3396_s2 }
 0x499   :  { %v412_v17 = vpop.xlane.xlu0 %411 }
 0x49a   :  { %3314 = vrcp.f32 %v412_v17 }
 0x49d   :  { %v415_v18 = vpop.xlane.xlu1 %414  ;;  %v573_v23 = vpop.permute.xlu0 %572 }
 0x49e   :  { %3316 = vrcp.f32 %v415_v18 }
 0x4a1   :  { %v651_v24 = vpop.permute.xlu1 %650 }
 0x4a4   :  { %v3315_v19 = vpop.eup %3314 }
 0x4a5   :  { %v417_v20 = vmul.f32 %v3315_v19, %v3311_v11 }
 0x4a7   :  { %3019 = vmatmul.mubr.msk.f32.vlgmr.msra.gmra.mrb[2].mxu0 %vm397_vm3, %v417_v20 }
 0x4a8   :  { %v3317_v21 = vpop.eup %3316  ;;  %3027 = vmatpush3.xpose.msk.msra.mxu0 %vm231_vm2, %v575_v15  ;;  %3028 = vmatprep.mubr.msk.f32.mxu0 %vm3391_vm1, %v3390_v36 }
 0x4a9   :  { %v419_v22 = vmul.f32 %v3317_v21, %v3313_v13  ;;  %3036 = vmatprep.subr.mxu0 %v3390_v36 }
 0x4ab   :  { %3024 = vmatmul.mubr.msk.f32.vlgmr.msra.gmra.mrb[4].mxu1 %vm397_vm3, %v419_v22  ;;  %3029 = vmatmul.mubr.msk.f32.vlgmr.msra.gmra.mrb[4].mxu0 %vm231_vm2, %v573_v23 }
 0x4ac   :  { %3032 = vmatpush3.xpose.msk.msra.mxu1 %vm231_vm2, %v653_v16  ;;  %3033 = vmatprep.mubr.msk.f32.mxu1 %vm3391_vm1, %v3390_v36 }
 0x4ad   :  { %3041 = vmatprep.subr.mxu1 %v3390_v36  ;;  %3038 = vmatprep.mubr.msk.f32.mxu0 %vm3391_vm1, %v3390_v36 }
 0x4af   :  { %3034 = vmatmul.mubr.msk.f32.vlgmr.msra.gmra.mrb[6].mxu1 %vm231_vm2, %v651_v24 }
 0x4b0   :  { %3043 = vmatprep.mubr.msk.f32.mxu1 %vm3391_vm1, %v3390_v36 }
 0x57a   :  { %v3608_v25 = vpop.f32.mrb[2].mxu0 }
 0x57b   :  { %v3020_v26 = vpop.f32.mrb[3].mxu0 }
 0x57e   :  { %v568_v27 = vpop.f32.mrb[4].mxu1  ;;  %v646_v28 = vpop.f32.mrb[4].mxu0 }
 0x57f   :  { %v728_v29 = vmul.f32 0.25, %v646_v28  ;;  %v3025_v30 = vpop.f32.mrb[5].mxu1  ;;  %v3030_v31 = vpop.f32.mrb[5].mxu0  ;;  %v1124_v28 = vld [vmem:[%s3940_s10 + $0x8] sm:$0xff] }
 0x580   :  { %v1125_v30 = vld [vmem:[%s3940_s10 + $0x10] sm:$0xff]  ;;  %v1126_v31 = vld [vmem:[%s3940_s10 + $0x18] sm:$0xff] }
 0x581   :  { %v730_v32 = vadd.f32 %v728_v29, %v3568_v54 }
 0x582   :  { %v724_v34 = vpop.f32.mrb[6].mxu1 }
 0x583   :  { %v729_v37 = vmul.f32 0.25, %v724_v34  ;;  %v3035_v38 = vpop.f32.mrb[7].mxu1  ;;  %v732_v40 = vsel %vm397_vm3, %v730_v32, -inf }
 0x584   :  { %733 = vmax.xlane.f32.xlu0 %v732_v40 }
 0x585   :  { %v731_v42 = vadd.f32 %v729_v37, %v3571_v60 }
 0x587   :  { %v735_v43 = vsel %vm397_vm3, %v731_v42, -inf }
 0x588   :  { %736 = vmax.xlane.f32.xlu1 %v735_v43 }
 0x599   :  { %830 = vrot.lane.b32.xlu1 %v3540_v39, %s3397_s23 }
 0x611   :  { %v734_v44 = vpop.xlane.xlu0 %733 }
 0x612   :  { %v738_v45 = vsub.f32 %v730_v32, %v734_v44  ;;  %v3223_v32 = vpack.c.bf16 %v1126_v31, %v1125_v30 }
 0x614   :  { %v740_v47 = vmul.f32 1.442695, %v738_v45  ;;  %v2823_v45 = vld [vmem:[%s3938_s8] ss:$0 sm:$0xff] }
 0x615   :  { %v737_v49 = vpop.xlane.xlu1 %736 }
 0x616   :  { %3318 = vpow2.f32 %v740_v47  ;;  %v739_v50 = vsub.f32 %v731_v42, %v737_v49 }
 0x618   :  { %v742_v51 = vmul.f32 1.442695, %v739_v50 }
 0x619   :  { %v831_v52 = vpop.permute.xlu1 %830 }
 0x61a   :  { %3320 = vpow2.f32 %v742_v51  ;;  %3042 = vmatpush3.msra.mxu1 %v831_v52  ;;  %v2824_v51 = vld [vmem:[%s3939_s9] ss:$0 sm:$0xff] }
 0x620   :  { %v3319_v53 = vpop.eup %3318 }
 0x621   :  { %v744_v55 = vsel %vm397_vm3, %v3319_v53, 0.0 }
 0x622   :  { %745 = vadd.xlane.f32.xlu0 %v744_v55 }
 0x624   :  { %v3321_v56 = vpop.eup %3320 }
 0x625   :  { %v747_v57 = vsel %vm397_vm3, %v3321_v56, 0.0 }
 0x626   :  { %748 = vadd.xlane.f32.xlu0 %v747_v57  ;;  %v1233_v57 = vld [vmem:[%s3942_s12] sm:$0xff] }
 0x63c   :  { %754 = vrot.lane.b32.xlu0 %v3542_v41, %s3397_s23  ;;  %v227_v41 = vld [vmem:[%s3936_s6 + $0x18] sm:$0xff] }
 0x63d   :  { %v3211_v2 = vpack.c.bf16 %v227_v41, %v226_v1  ;;  %v1239_v41 = vld [vmem:[%s3942_s12 + $0x30] sm:$0xff] }
 0x6af   :  { %v746_v39 = vpop.xlane.xlu0 %745 }
 0x6b0   :  { %3322 = vrcp.f32 %v746_v39  ;;  %v1234_v39 = vld [vmem:[%s3942_s12 + $0x8] sm:$0xff] }
 0x6b3   :  { %v749_v58 = vpop.xlane.xlu0 %748 }
 0x6b4   :  { %3324 = vrcp.f32 %v749_v58  ;;  %v3227_v58 = vpack.c.bf16 %v1234_v39, %v1233_v57 }
 0x6b7   :  { %v755_v59 = vpop.permute.xlu0 %754 }
 0x6b8   :  { %3037 = vmatpush3.msra.mxu0 %v755_v59  ;;  %v1235_v59 = vld [vmem:[%s3942_s12 + $0x10] sm:$0xff] }
 0x6b9   :  { %3212 = vmatprep.subr.bf16.mxu0 %v3211_v2 }
 0x6ba   :  { %v3323_v61 = vpop.eup %3322 }
 0x6bb   :  { %v751_v62 = vmul.f32 %v3323_v61, %v3319_v53  ;;  %v1236_v61 = vld [vmem:[%s3942_s12 + $0x18] sm:$0xff] }
 0x6bd   :  { %3039 = vmatmul.mubr.msk.f32.vlgmr.msra.gmra.mrb[6].mxu0 %vm397_vm3, %v751_v62  ;;  %v3231_v62 = vpack.c.bf16 %v1236_v61, %v1235_v59 }
 0x6be   :  { %v3325_v63 = vpop.eup %3324  ;;  %3214 = vmatpush3.bf16.msra.mxu0 %v3211_v2  ;;  %v1240_v2 = vld [vmem:[%s3942_s12 + $0x38] sm:$0xff] }
 0x6bf   :  { %v753_v0 = vmul.f32 %v3325_v63, %v3321_v56  ;;  %3216 = vmatprep.subr.bf16.mxu0 %v3215_v5  ;;  %v1237_v63 = vld [vmem:[%s3942_s12 + $0x20] sm:$0xff]  ;;  %v3239_v3 = vpack.c.bf16 %v1240_v2, %v1239_v41 }
 0x6c1   :  { %3044 = vmatmul.mubr.msk.f32.vlgmr.msra.gmra.mrb[8].mxu1 %vm397_vm3, %v753_v0  ;;  %v1238_v0 = vld [vmem:[%s3942_s12 + $0x28] sm:$0xff] }
 0x6c2   :  { %v3235_v1 = vpack.c.bf16 %v1238_v0, %v1237_v63 }
 0x790   :  { %v826_v6 = vpop.f32.mrb[6].mxu0 }
 0x791   :  { %v3040_v7 = vpop.f32.mrb[7].mxu0  ;;  %3050 = vmatprep.mubr.msk.f32.mxu0 %vm231_vm2, %v826_v6 }
 0x794   :  { %v902_v8 = vpop.f32.mrb[8].mxu1 }
 0x795   :  { %v3045_v9 = vpop.f32.mrb[9].mxu1  ;;  %3051 = vmatmul.mubr.msk.f32.vlgmr.msra.gmra.mrb[8].mxu0 %vm231_vm2, %v902_v8 }
 0x796   :  { %3218 = vmatpush3.bf16.msra.mxu0 %v3215_v5  ;;  %3057 = vmatprep.mubr.msk.f32.mxu0 %vm231_vm2, %v3608_v25 }
 0x797   :  { %3228 = vmatprep.subr.bf16.mxu0 %v3227_v58 }
 0x79d   :  { %3058 = vmatmul.mubr.msk.f32.vlgmr.msra.gmra.mrb[8].mxu0 %vm231_vm2, %v568_v27 }
 0x79e   :  { %3230 = vmatpush3.bf16.msra.mxu0 %v3227_v58 }
 0x79f   :  { %3232 = vmatprep.subr.bf16.mxu0 %v3231_v62 }
 0x7a2   :  { %3234 = vmatpush3.bf16.msra.mxu0 %v3231_v62 }
 0x7a3   :  { %3236 = vmatprep.subr.bf16.mxu0 %v3235_v1 }
 0x7a6   :  { %3238 = vmatpush3.bf16.msra.mxu0 %v3235_v1  ;;  %v2831_v1 = vld [vmem:[%s3944_s14] ss:$0 sm:$0xff] }
 0x7a7   :  { %3240 = vmatprep.subr.bf16.mxu0 %v3239_v3 }
 0x7aa   :  { %3242 = vmatpush3.bf16.msra.mxu0 %v3239_v3 }
 0x7ab   :  { %3111 = vmatprep.subr.mxu0 %v3390_v36 }
 0x870   :  { %v3059_v11 = vpop.f32.mrb[8].mxu0 }
 0x871   :  { %v1076_v12 = vadd.f32 %v3059_v11, %v2822_v10  ;;  %v1059_v13 = vpop.f32.mrb[9].mxu0 }
 0x872   :  { %v1075_v14 = vadd.f32 %v2822_v10, %v1059_v13 }
 0x873   :  { %v1078_v15 = vadd.f32 %v1076_v12, %v3527_v35 }
 0x874   :  { %v1077_v16 = vadd.f32 %v1075_v14, %v3523_v33  ;;  %v1123_v33 = vld [vmem:[%s3940_s10] sm:$0xff] }
 0x875   :  { %v1084_v17 = vsel %vm64_vm0, %v1078_v15, 0.0  ;;  %v3219_v29 = vpack.c.bf16 %v1124_v28, %v1123_v33 }
 0x876   :  { %1085 = vadd.xlane.f32.xlu0 %v1084_v17  ;;  %v1081_v18 = vsel %vm64_vm0, %v1077_v16, 0.0 }
 0x877   :  { %1082 = vadd.xlane.f32.xlu1 %v1081_v18  ;;  %3220 = vmatprep.subr.bf16.mxu1 %v3219_v29 }
 0x878   :  { %3222 = vmatpush3.bf16.msra.mxu1 %v3219_v29 }
 0x879   :  { %3224 = vmatprep.subr.bf16.mxu1 %v3223_v32 }
 0x87c   :  { %3226 = vmatpush3.bf16.msra.mxu1 %v3223_v32 }
 0x903   :  { %v1086_v19 = vpop.xlane.xlu0 %1085 }
 0x904   :  { %v1088_v20 = vmul.f32 0.03125, %v1086_v19  ;;  %v1083_v21 = vpop.xlane.xlu1 %1082 }
 0x905   :  { %v1087_v22 = vmul.f32 0.03125, %v1083_v21 }
 0x906   :  { %v1090_v23 = vsub.f32 %v1078_v15, %v1088_v20 }
 0x907   :  { %v1089_v24 = vsub.f32 %v1077_v16, %v1087_v22 }
 0x908   :  { %v1092_v25 = vmul.f32 %v1090_v23, %v1090_v23 }
 0x909   :  { %v1091_v26 = vmul.f32 %v1089_v24, %v1089_v24 }
 0x90a   :  { %v1096_v27 = vsel %vm64_vm0, %v1092_v25, 0.0 }
 0x90b   :  { %1097 = vadd.xlane.f32.xlu1 %v1096_v27  ;;  %v1093_v35 = vsel %vm64_vm0, %v1091_v26, 0.0  ;;  %v2828_v27 = vld [vmem:[%s3943_s13] ss:$0 sm:$0xff] }
 0x90c   :  { %1094 = vadd.xlane.f32.xlu0 %v1093_v35 }
 0x998   :  { %v1098_v34 = vpop.xlane.xlu1 %1097 }
 0x999   :  { %v1100_v37 = vmul.f32 0.03125, %v1098_v34  ;;  %v1095_v38 = vpop.xlane.xlu0 %1094 }
 0x99a   :  { %v1099_v40 = vmul.f32 0.03125, %v1095_v38 }
 0x99b   :  { %v1102_v42 = vadd.f32 1e-12, %v1100_v37 }
 0x99c   :  { %v1101_v43 = vadd.f32 1e-12, %v1099_v40 }
 0x99d   :  { %3326 = vrsqrt.f32 %v1102_v42 }
 0x99e   :  { %3328 = vrsqrt.f32 %v1101_v43 }
 0x9a7   :  { %v3327_v44 = vpop.eup %3326 }
 0x9a8   :  { %v3329_v47 = vpop.eup %3328  ;;  %v1106_v49 = vmul.f32 %v3327_v44, %v1090_v23 }
 0x9a9   :  { %v1105_v50 = vmul.f32 %v3329_v47, %v1089_v24 }
 0x9aa   :  { %v1114_v52 = vmul.f32 %v2823_v45, %v1106_v49 }
 0x9ab   :  { %v1113_v53 = vmul.f32 %v2823_v45, %v1105_v50 }
 0x9ac   :  { %v1122_v56 = vadd.f32 %v2824_v51, %v1114_v52  ;;  %v2834_v52 = vld [vmem:[%s3934_s4 + $0x28] sm:$0xff] }
 0x9ad   :  { %v1121_v55 = vadd.f32 %v2824_v51, %v1113_v53  ;;  %v2833_v51 = vld [vmem:[%s3934_s4 + $0x20] sm:$0xff] }
 0x9ae   :  { %v3243_v53 = vpack.c.bf16 %v2834_v52, %v2833_v51 }
 0x9af   :  { %3068 = vmatprep.mubr.msk.f32.mxu1 %vm64_vm0, %v1121_v55 }
 0x9b0   :  { %3069 = vmatmul.mubr.msk.f32.vlgmr.msra.gmra.mrb[10].mxu1 %vm64_vm0, %v1122_v56  ;;  %3244 = vmatprep.subr.bf16.mxu1 %v3243_v53 }
 0x9b1   :  { %3246 = vmatpush3.bf16.msra.mxu1 %v3243_v53 }
 0xa83   :  { %v3070_v5 = vpop.f32.mrb[10].mxu1 }
 0xa84   :  { %v1212_v6 = vadd.f32 %v3070_v5, %v2825_v4  ;;  %v1206_v7 = vpop.f32.mrb[11].mxu1 }
 0xa85   :  { %v1207_v8 = vadd.f32 %v2825_v4, %v1206_v7  ;;  %v2832_v4 = vld [vmem:[%s3945_s15] ss:$0 sm:$0xff] }
 0xa86   :  { %v1218_v9 = vmul.f32 0.044715, %v1212_v6  ;;  %v1216_v24 = vmul.f32 0.5, %v1212_v6 }
 0xa87   :  { %v1217_v10 = vmul.f32 0.044715, %v1207_v8  ;;  %v1215_v22 = vmul.f32 0.5, %v1207_v8 }
 0xa88   :  { %v1220_v11 = vmul.f32 %v1218_v9, %v1212_v6  ;;  %v2838_v9 = vld [vmem:[%s3935_s5 + $0x1] ss:$0 sm:$0xff] }
 0xa89   :  { %v1219_v12 = vmul.f32 %v1217_v10, %v1207_v8 }
 0xa8a   :  { %v1222_v13 = vmul.f32 %v1220_v11, %v1212_v6 }
 0xa8b   :  { %v1221_v14 = vmul.f32 %v1219_v12, %v1207_v8 }
 0xa8c   :  { %v1224_v15 = vadd.f32 %v1222_v13, %v1212_v6 }
 0xa8d   :  { %v1223_v16 = vadd.f32 %v1221_v14, %v1207_v8 }
 0xa8e   :  { %v1226_v17 = vmul.f32 0.7978846, %v1224_v15 }
 0xa8f   :  { %v1225_v18 = vmul.f32 0.7978846, %v1223_v16 }
 0xa90   :  { %3330 = vtanh.f32 %v1226_v17 }
 0xa91   :  { %3332 = vtanh.f32 %v1225_v18 }
 0xa9a   :  { %v3331_v19 = vpop.eup %3330 }
 0xa9b   :  { %v3333_v20 = vpop.eup %3332  ;;  %v1230_v21 = vadd.f32 1.0, %v3331_v19 }
 0xa9c   :  { %v1229_v23 = vadd.f32 1.0, %v3333_v20 }
 0xa9d   :  { %v1232_v26 = vmul.f32 %v1230_v21, %v1216_v24 }
 0xa9e   :  { %v1231_v25 = vmul.f32 %v1229_v23, %v1215_v22 }
 0xaa0   :  { %3087 = vmatprep.mubr.msk.f32.mxu0 %vm1248_vm4, %v1231_v25 }
 0xaa1   :  { %3088 = vmatmul.mubr.msk.f32.vlgmr.msra.gmra.mrb[10].mxu0 %vm1248_vm4, %v1232_v26 }
 0xaa2   :  { %3113 = vmatprep.mubr.msk.f32.mxu0 %vm3391_vm1, %v3390_v36 }
 0xb74   :  { %v3089_v35 = vpop.f32.mrb[10].mxu0 }
 0xb75   :  { %v1327_v33 = vadd.f32 %v3089_v35, %v2828_v27  ;;  %v1321_v28 = vpop.f32.mrb[11].mxu0 }
 0xb76   :  { %v1322_v29 = vadd.f32 %v2828_v27, %v1321_v28 }
 0xb77   :  { %v1331_v30 = vadd.f32 %v1327_v33, %v1122_v56  ;;  %v2836_v56 = vld [vmem:[%s3934_s4 + $0x38] sm:$0xff] }
 0xb78   :  { %v1330_v31 = vadd.f32 %v1322_v29, %v1121_v55  ;;  %v2835_v55 = vld [vmem:[%s3934_s4 + $0x30] sm:$0xff] }
 0xb79   :  { %v1337_v32 = vsel %vm64_vm0, %v1331_v30, 0.0  ;;  %v3247_v57 = vpack.c.bf16 %v2836_v56, %v2835_v55 }
 0xb7a   :  { %1338 = vadd.xlane.f32.xlu1 %v1337_v32  ;;  %v1334_v34 = vsel %vm64_vm0, %v1330_v31, 0.0 }
 0xb7b   :  { %1335 = vadd.xlane.f32.xlu0 %v1334_v34  ;;  %3248 = vmatprep.subr.bf16.mxu1 %v3247_v57 }
 0xb7c   :  { %3250 = vmatpush3.bf16.msra.mxu1 %v3247_v57 }
 0xb7d   :  { %3101 = vmatprep.subr.mxu1 %v3390_v36 }
 0xc07   :  { %v1339_v37 = vpop.xlane.xlu1 %1338 }
 0xc08   :  { %v1341_v38 = vmul.f32 0.03125, %v1339_v37  ;;  %v1336_v40 = vpop.xlane.xlu0 %1335 }
 0xc09   :  { %v1340_v42 = vmul.f32 0.03125, %v1336_v40 }
 0xc0a   :  { %v1343_v43 = vsub.f32 %v1331_v30, %v1341_v38 }
 0xc0b   :  { %v1342_v44 = vsub.f32 %v1330_v31, %v1340_v42 }
 0xc0c   :  { %v1345_v45 = vmul.f32 %v1343_v43, %v1343_v43 }
 0xc0d   :  { %v1344_v47 = vmul.f32 %v1342_v44, %v1342_v44 }
 0xc0e   :  { %v1349_v49 = vsel %vm64_vm0, %v1345_v45, 0.0 }
 0xc0f   :  { %1350 = vadd.xlane.f32.xlu1 %v1349_v49  ;;  %v1346_v50 = vsel %vm64_vm0, %v1344_v47, 0.0 }
 0xc10   :  { %1347 = vadd.xlane.f32.xlu0 %v1346_v50 }
 0xc9c   :  { %v1351_v39 = vpop.xlane.xlu1 %1350 }
 0xc9d   :  { %v1353_v58 = vmul.f32 0.03125, %v1351_v39  ;;  %v1348_v59 = vpop.xlane.xlu0 %1347 }
 0xc9e   :  { %v1352_v61 = vmul.f32 0.03125, %v1348_v59 }
 0xc9f   :  { %v1355_v62 = vadd.f32 1e-12, %v1353_v58 }
 0xca0   :  { %v1354_v63 = vadd.f32 1e-12, %v1352_v61 }
 0xca1   :  { %3334 = vrsqrt.f32 %v1355_v62 }
 0xca2   :  { %3336 = vrsqrt.f32 %v1354_v63 }
 0xcab   :  { %v3335_v0 = vpop.eup %3334 }
 0xcac   :  { %v3337_v41 = vpop.eup %3336  ;;  %v1359_v2 = vmul.f32 %v3335_v0, %v1343_v43 }
 0xcad   :  { %v1358_v3 = vmul.f32 %v3337_v41, %v1342_v44 }
 0xcae   :  { %v1367_v5 = vmul.f32 %v2831_v1, %v1359_v2 }
 0xcaf   :  { %v1366_v6 = vmul.f32 %v2831_v1, %v1358_v3 }
 0xcb0   :  { %v3728_v8 = vadd.f32 %v2832_v4, %v1367_v5 }
 0xcb1   :  { %v3726_v7 = vadd.f32 %v2832_v4, %v1366_v6 }
 0xcb3   :  { %3098 = vmatprep.mubr.msk.f32.mxu1 %vm64_vm0, %v3726_v7 }
 0xcb4   :  { %3099 = vmatmul.mubr.msk.f32.vlgmr.msra.gmra.mrb[12].mxu1 %vm64_vm0, %v3728_v8 }
 0xcb5   :  { %3103 = vmatprep.mubr.msk.f32.mxu1 %vm3391_vm1, %v3390_v36 }
 0xd87   :  { %v3100_v10 = vpop.f32.mrb[12].mxu1 }
 0xd88   :  { %v3739_v11 = vadd.f32 %v3100_v10, %v2838_v9  ;;  %v1461_v12 = vpop.f32.mrb[13].mxu1 }
 0xd89   :  { %v3741_v13 = vadd.f32 %v2838_v9, %v1461_v12 }
 0xd8a   :  { %1553 = vrot.lane.b32.xlu1 %v3739_v11, %s3392_s0 }
 0xd8b   :  { %1476 = vrot.lane.b32.xlu0 %v3741_v13, %s3392_s0 }
 0xdfc   :  { %v1554_v15 = vpop.permute.xlu1 %1553 }
 0xdfd   :  { %v1477_v14 = vpop.permute.xlu0 %1476 }
 0xdfe   :  { %3102 = vmatpush3.xpose.msk.msra.mxu1 %vm231_vm2, %v1477_v14 }
 0xdff   :  { %3106 = vmatprep.subr.mxu1 %v3390_v36 }
 0xe01   :  { %3104 = vmatmul.mubr.msk.f32.vlgmr.msra.gmra.mrb[14].mxu1 %vm231_vm2, %v3741_v13 }
 0xe02   :  { %3107 = vmatpush3.xpose.msk.msra.mxu1 %vm231_vm2, %v1554_v15  ;;  %3108 = vmatprep.mubr.msk.f32.mxu1 %vm3391_vm1, %v3390_v36 }
 0xe03   :  { %3116 = vmatprep.subr.mxu1 %v3390_v36 }
 0xe05   :  { %3109 = vmatmul.mubr.msk.f32.vlgmr.msra.gmra.mrb[16].mxu1 %vm231_vm2, %v3739_v11 }
 0xe06   :  { %3118 = vmatprep.mubr.msk.f32.mxu1 %vm3391_vm1, %v3390_v36 }
 0xed4   :  { %v1548_v16 = vpop.f32.mrb[14].mxu1 }
 0xed5   :  { %v1629_v17 = vmul.f32 0.25, %v1548_v16  ;;  %v3105_v18 = vpop.f32.mrb[15].mxu1 }
 0xed7   :  { %v1631_v19 = vadd.f32 %v1629_v17, %v3568_v54 }
 0xed8   :  { %v1625_v20 = vpop.f32.mrb[16].mxu1 }
 0xed9   :  { %v1630_v21 = vmul.f32 0.25, %v1625_v20  ;;  %v3110_v22 = vpop.f32.mrb[17].mxu1  ;;  %v1633_v23 = vsel %vm397_vm3, %v1631_v19, -inf }
 0xeda   :  { %1634 = vmax.xlane.f32.xlu1 %v1633_v23  ;;  %v2843_v22 = vld [vmem:[%s3936_s6 + $0x30] sm:$0xff] }
 0xedb   :  { %v1632_v24 = vadd.f32 %v1630_v21, %v3571_v60 }
 0xedd   :  { %v1636_v25 = vsel %vm397_vm3, %v1632_v24, -inf }
 0xede   :  { %1637 = vmax.xlane.f32.xlu0 %v1636_v25  ;;  %v2842_v25 = vld [vmem:[%s3936_s6 + $0x28] sm:$0xff] }
 0xeeb   :  { %1731 = vrot.lane.b32.xlu1 %v3739_v11, %s3394_s21 }
 0xeef   :  { %1809 = vrot.lane.b32.xlu1 %v3741_v13, %s3395_s22 }
 0xef3   :  { %1887 = vrot.lane.b32.xlu1 %v3739_v11, %s3395_s22 }
 0xef4   :  { %1655 = vrot.lane.b32.xlu0 %v3741_v13, %s3394_s21 }
 0xf67   :  { %v1635_v26 = vpop.xlane.xlu1 %1634 }
 0xf68   :  { %v1639_v27 = vsub.f32 %v1631_v19, %v1635_v26 }
 0xf6a   :  { %v1641_v35 = vmul.f32 1.442695, %v1639_v27 }
 0xf6b   :  { %v1732_v33 = vpop.permute.xlu1 %1731  ;;  %v1638_v28 = vpop.xlane.xlu0 %1637 }
 0xf6c   :  { %3338 = vpow2.f32 %v1641_v35  ;;  %v1640_v29 = vsub.f32 %v1632_v24, %v1638_v28  ;;  %3117 = vmatpush3.msra.mxu1 %v1732_v33  ;;  %v2841_v24 = vld [vmem:[%s3936_s6 + $0x20] sm:$0xff] }
 0xf6d   :  { %3126 = vmatprep.subr.mxu1 %v3390_v36  ;;  %v3255_v26 = vpack.c.bf16 %v2842_v25, %v2841_v24 }
 0xf6e   :  { %v1643_v30 = vmul.f32 1.442695, %v1640_v29  ;;  %v2862_v29 = vld [vmem:[%s3937_s7 + $0x1] ss:$0 sm:$0xff] }
 0xf6f   :  { %v1656_v31 = vpop.permute.xlu0 %1655  ;;  %v1810_v40 = vpop.permute.xlu1 %1809 }
 0xf70   :  { %3340 = vpow2.f32 %v1643_v30  ;;  %3112 = vmatpush3.msra.mxu0 %v1656_v31 }
 0xf71   :  { %3121 = vmatprep.subr.mxu0 %v3390_v36 }
 0xf73   :  { %v1888_v42 = vpop.permute.xlu1 %1887 }
 0xf76   :  { %v3339_v32 = vpop.eup %3338 }
 0xf77   :  { %v1645_v34 = vsel %vm397_vm3, %v3339_v32, 0.0 }
 0xf78   :  { %1646 = vadd.xlane.f32.xlu0 %v1645_v34 }
 0xf7a   :  { %v3341_v37 = vpop.eup %3340 }
 0xf7b   :  { %v1648_v38 = vsel %vm397_vm3, %v3341_v37, 0.0 }
 0xf7c   :  { %1649 = vadd.xlane.f32.xlu1 %v1648_v38 }
 0xf8d   :  { %1885 = vrot.lane.b32.xlu1 %v3739_v11, %s3396_s2 }
 0xf8e   :  { %1807 = vrot.lane.b32.xlu0 %v3741_v13, %s3396_s2 }
0x1005   :  { %v1647_v43 = vpop.xlane.xlu0 %1646 }
0x1006   :  { %3342 = vrcp.f32 %v1647_v43 }
0x1009   :  { %v1650_v44 = vpop.xlane.xlu1 %1649  ;;  %v1808_v51 = vpop.permute.xlu0 %1807 }
0x100a   :  { %3344 = vrcp.f32 %v1650_v44 }
0x100d   :  { %v1886_v52 = vpop.permute.xlu1 %1885 }
0x1010   :  { %v3343_v45 = vpop.eup %3342 }
0x1011   :  { %v1652_v47 = vmul.f32 %v3343_v45, %v3339_v32 }
0x1013   :  { %3114 = vmatmul.mubr.msk.f32.vlgmr.msra.gmra.mrb[12].mxu0 %vm397_vm3, %v1652_v47 }
0x1014   :  { %v3345_v49 = vpop.eup %3344  ;;  %3122 = vmatpush3.xpose.msk.msra.mxu0 %vm231_vm2, %v1810_v40  ;;  %3123 = vmatprep.mubr.msk.f32.mxu0 %vm3391_vm1, %v3390_v36 }
0x1015   :  { %v1654_v50 = vmul.f32 %v3345_v49, %v3341_v37  ;;  %3131 = vmatprep.subr.mxu0 %v3390_v36 }
0x1017   :  { %3119 = vmatmul.mubr.msk.f32.vlgmr.msra.gmra.mrb[18].mxu1 %vm397_vm3, %v1654_v50  ;;  %3124 = vmatmul.mubr.msk.f32.vlgmr.msra.gmra.mrb[14].mxu0 %vm231_vm2, %v1808_v51 }
0x1018   :  { %3127 = vmatpush3.xpose.msk.msra.mxu1 %vm231_vm2, %v1888_v42  ;;  %3128 = vmatprep.mubr.msk.f32.mxu1 %vm3391_vm1, %v3390_v36 }
0x1019   :  { %3136 = vmatprep.subr.mxu1 %v3390_v36  ;;  %3133 = vmatprep.mubr.msk.f32.mxu0 %vm3391_vm1, %v3390_v36 }
0x101b   :  { %3129 = vmatmul.mubr.msk.f32.vlgmr.msra.gmra.mrb[20].mxu1 %vm231_vm2, %v1886_v52 }
0x101c   :  { %3138 = vmatprep.mubr.msk.f32.mxu1 %vm3391_vm1, %v3390_v36 }
0x10e6   :  { %v1727_v53 = vpop.f32.mrb[12].mxu0 }
0x10e7   :  { %v3115_v55 = vpop.f32.mrb[13].mxu0 }
0x10e8   :  { %v2868_v55 = vld [vmem:[%s3940_s10 + $0x28] sm:$0xff] }
0x10ea   :  { %v1803_v56 = vpop.f32.mrb[18].mxu1  ;;  %v1881_v57 = vpop.f32.mrb[14].mxu0 }
0x10eb   :  { %v1963_v39 = vmul.f32 0.25, %v1881_v57  ;;  %v3120_v58 = vpop.f32.mrb[19].mxu1  ;;  %v3125_v59 = vpop.f32.mrb[15].mxu0  ;;  %v2869_v57 = vld [vmem:[%s3940_s10 + $0x30] sm:$0xff] }
0x10ed   :  { %v1965_v61 = vadd.f32 %v1963_v39, %v3568_v54  ;;  %v2870_v39 = vld [vmem:[%s3940_s10 + $0x38] sm:$0xff] }
0x10ee   :  { %v1959_v62 = vpop.f32.mrb[20].mxu1  ;;  %v3263_v58 = vpack.c.bf16 %v2870_v39, %v2869_v57 }
0x10ef   :  { %v1964_v63 = vmul.f32 0.25, %v1959_v62  ;;  %v3130_v0 = vpop.f32.mrb[21].mxu1  ;;  %v1967_v1 = vsel %vm397_vm3, %v1965_v61, -inf }
0x10f0   :  { %1968 = vmax.xlane.f32.xlu0 %v1967_v1 }
0x10f1   :  { %v1966_v41 = vadd.f32 %v1964_v63, %v3571_v60 }
0x10f3   :  { %v1970_v2 = vsel %vm397_vm3, %v1966_v41, -inf }
0x10f4   :  { %1971 = vmax.xlane.f32.xlu1 %v1970_v2  ;;  %v2865_v2 = vld [vmem:[%s3938_s8 + $0x1] ss:$0 sm:$0xff] }
0x1105   :  { %2065 = vrot.lane.b32.xlu1 %v3739_v11, %s3397_s23 }
0x117d   :  { %v1969_v3 = vpop.xlane.xlu0 %1968 }
0x117e   :  { %v1973_v4 = vsub.f32 %v1965_v61, %v1969_v3 }
0x1180   :  { %v1975_v5 = vmul.f32 1.442695, %v1973_v4 }
0x1181   :  { %v1972_v6 = vpop.xlane.xlu1 %1971 }
0x1182   :  { %3346 = vpow2.f32 %v1975_v5  ;;  %v1974_v54 = vsub.f32 %v1966_v41, %v1972_v6  ;;  %v2866_v6 = vld [vmem:[%s3939_s9 + $0x1] ss:$0 sm:$0xff] }
0x1184   :  { %v1977_v9 = vmul.f32 1.442695, %v1974_v54 }
0x1185   :  { %v2066_v10 = vpop.permute.xlu1 %2065 }
0x1186   :  { %3348 = vpow2.f32 %v1977_v9  ;;  %3137 = vmatpush3.msra.mxu1 %v2066_v10 }
0x118c   :  { %v3347_v12 = vpop.eup %3346 }
0x118d   :  { %v1979_v14 = vsel %vm397_vm3, %v3347_v12, 0.0 }
0x118e   :  { %1980 = vadd.xlane.f32.xlu0 %v1979_v14  ;;  %v2875_v14 = vld [vmem:[%s3942_s12 + $0x40] sm:$0xff] }
0x1190   :  { %v3349_v60 = vpop.eup %3348 }
0x1191   :  { %v1982_v15 = vsel %vm397_vm3, %v3349_v60, 0.0 }
0x1192   :  { %1983 = vadd.xlane.f32.xlu0 %v1982_v15 }
0x11a8   :  { %1989 = vrot.lane.b32.xlu0 %v3741_v13, %s3397_s23  ;;  %v2844_v13 = vld [vmem:[%s3936_s6 + $0x38] sm:$0xff]  ;;  %s3399_s23 = smov [#allocation2]  }
0x11a9   :  { %v3251_v23 = vpack.c.bf16 %v2844_v13, %v2843_v22  ;;  %v2882_v22 = vld [vmem:[%s3942_s12 + $0x78] sm:$0xff]  ;;  %s2792_s24 = sshll.u32 %s3399_s23, 4  ;;  %s2793_s24 = int_to_ptr.vmem [resolvable:$true] %s2792_s24 }
0x11aa   :  { %p3371_p1 = scmp.lt.s32.totalorder %s2793_s24, %s2793_s24 }
0x121b   :  { %v1981_v11 = vpop.xlane.xlu0 %1980 }
0x121c   :  { %3350 = vrcp.f32 %v1981_v11  ;;  %v2877_v11 = vld [vmem:[%s3942_s12 + $0x50] sm:$0xff] }
0x121f   :  { %v1984_v16 = vpop.xlane.xlu0 %1983 }
0x1220   :  { %3352 = vrcp.f32 %v1984_v16  ;;  %v2878_v16 = vld [vmem:[%s3942_s12 + $0x58] sm:$0xff] }
0x1223   :  { %v1990_v17 = vpop.permute.xlu0 %1989 }
0x1224   :  { %3132 = vmatpush3.msra.mxu0 %v1990_v17  ;;  %v3271_v17 = vpack.c.bf16 %v2878_v16, %v2877_v11 }
0x1225   :  { %3252 = vmatprep.subr.bf16.mxu0 %v3251_v23 }
0x1226   :  { %v3351_v18 = vpop.eup %3350 }
0x1227   :  { %v1986_v19 = vmul.f32 %v3351_v18, %v3347_v12  ;;  %v2879_v18 = vld [vmem:[%s3942_s12 + $0x60] sm:$0xff] }
0x1229   :  { %3134 = vmatmul.mubr.msk.f32.vlgmr.msra.gmra.mrb[16].mxu0 %vm397_vm3, %v1986_v19  ;;  %v2880_v19 = vld [vmem:[%s3942_s12 + $0x68] sm:$0xff] }
0x122a   :  { %v3353_v20 = vpop.eup %3352  ;;  %3254 = vmatpush3.bf16.msra.mxu0 %v3251_v23  ;;  %v2872_v23 = vld [vmem:[%s3941_s11 + $0x1] ss:$0 sm:$0xff] }
0x122b   :  { %v1988_v21 = vmul.f32 %v3353_v20, %v3349_v60  ;;  %3256 = vmatprep.subr.bf16.mxu0 %v3255_v26  ;;  %v2876_v60 = vld [vmem:[%s3942_s12 + $0x48] sm:$0xff]  ;;  %v3275_v20 = vpack.c.bf16 %v2880_v19, %v2879_v18  ;;  %v2622_v19 = vand.u32 127, %v121_v46  ;;  %v2702_v46 = vld [vmem:[%s3946_s16 + $0x10] sm:$0xff] }
0x122c   :  { %v3267_v15 = vpack.c.bf16 %v2876_v60, %v2875_v14  ;;  %v2889_v60 = vld [vmem:[%s3944_s14 + $0x1] ss:$0 sm:$0xff] }
0x122d   :  { %3139 = vmatmul.mubr.msk.f32.vlgmr.msra.gmra.mrb[22].mxu1 %vm397_vm3, %v1988_v21  ;;  %v2881_v21 = vld [vmem:[%s3942_s12 + $0x70] sm:$0xff] }
0x122e   :  { %v3279_v13 = vpack.c.bf16 %v2882_v22, %v2881_v21 }
0x12fc   :  { %v2061_v27 = vpop.f32.mrb[16].mxu0 }
0x12fd   :  { %v3135_v35 = vpop.f32.mrb[17].mxu0  ;;  %3145 = vmatprep.mubr.msk.f32.mxu0 %vm231_vm2, %v2061_v27 }
0x1300   :  { %v2137_v33 = vpop.f32.mrb[22].mxu1 }
0x1301   :  { %v3140_v28 = vpop.f32.mrb[23].mxu1  ;;  %3146 = vmatmul.mubr.msk.f32.vlgmr.msra.gmra.mrb[18].mxu0 %vm231_vm2, %v2137_v33 }
0x1302   :  { %3258 = vmatpush3.bf16.msra.mxu0 %v3255_v26  ;;  %3152 = vmatprep.mubr.msk.f32.mxu0 %vm231_vm2, %v1727_v53 }
0x1303   :  { %3268 = vmatprep.subr.bf16.mxu0 %v3267_v15 }
0x1309   :  { %3153 = vmatmul.mubr.msk.f32.vlgmr.msra.gmra.mrb[18].mxu0 %vm231_vm2, %v1803_v56 }
0x130a   :  { %3270 = vmatpush3.bf16.msra.mxu0 %v3267_v15 }
0x130b   :  { %3272 = vmatprep.subr.bf16.mxu0 %v3271_v17 }
0x130e   :  { %3274 = vmatpush3.bf16.msra.mxu0 %v3271_v17  ;;  %v2890_v17 = vld [vmem:[%s3945_s15 + $0x1] ss:$0 sm:$0xff] }
0x130f   :  { %3276 = vmatprep.subr.bf16.mxu0 %v3275_v20 }
0x1312   :  { %3278 = vmatpush3.bf16.msra.mxu0 %v3275_v20  ;;  %v2623_v20 = vmul.u32 8, %v3561_v48  ;;  %v2703_v48 = vld [vmem:[%s3946_s16 + $0x18] sm:$0xff] }
0x1313   :  { %3280 = vmatprep.subr.bf16.mxu0 %v3279_v13 }
0x1314   :  { %vm2624_vm5 = vcmp.eq.s32.totalorder %v2622_v19, %v2623_v20 }
0x1316   :  { %3282 = vmatpush3.bf16.msra.mxu0 %v3279_v13 }
0x13dc   :  { %v3154_v30 = vpop.f32.mrb[18].mxu0 }
0x13dd   :  { %v2312_v31 = vadd.f32 %v3154_v30, %v2862_v29  ;;  %v2294_v32 = vpop.f32.mrb[19].mxu0 }
0x13de   :  { %v2311_v34 = vadd.f32 %v2862_v29, %v2294_v32 }
0x13df   :  { %v2314_v37 = vadd.f32 %v2312_v31, %v3728_v8 }
0x13e0   :  { %v2313_v38 = vadd.f32 %v2311_v34, %v3726_v7  ;;  %v2867_v7 = vld [vmem:[%s3940_s10 + $0x20] sm:$0xff] }
0x13e1   :  { %v2322_v40 = vsel %vm64_vm0, %v2314_v37, 0.0  ;;  %v3259_v56 = vpack.c.bf16 %v2868_v55, %v2867_v7 }
0x13e2   :  { %2323 = vadd.xlane.f32.xlu0 %v2322_v40  ;;  %v2319_v42 = vsel %vm64_vm0, %v2313_v38, 0.0 }
0x13e3   :  { %2320 = vadd.xlane.f32.xlu1 %v2319_v42  ;;  %3260 = vmatprep.subr.bf16.mxu1 %v3259_v56 }
0x13e4   :  { %3262 = vmatpush3.bf16.msra.mxu1 %v3259_v56 }
0x13e5   :  { %3264 = vmatprep.subr.bf16.mxu1 %v3263_v58 }
0x13e8   :  { %3266 = vmatpush3.bf16.msra.mxu1 %v3263_v58 }
0x146f   :  { %v2324_v43 = vpop.xlane.xlu0 %2323 }
0x1470   :  { %v2326_v44 = vmul.f32 0.03125, %v2324_v43  ;;  %v2321_v45 = vpop.xlane.xlu1 %2320 }
0x1471   :  { %v2325_v47 = vmul.f32 0.03125, %v2321_v45 }
0x1472   :  { %v2328_v49 = vsub.f32 %v2314_v37, %v2326_v44 }
0x1473   :  { %v2327_v50 = vsub.f32 %v2313_v38, %v2325_v47 }
0x1474   :  { %v2330_v51 = vmul.f32 %v2328_v49, %v2328_v49 }
0x1475   :  { %v2329_v52 = vmul.f32 %v2327_v50, %v2327_v50 }
0x1476   :  { %v2334_v53 = vsel %vm64_vm0, %v2330_v51, 0.0  ;;  %v2884_v51 = vld [vmem:[%s3943_s13 + $0x1] ss:$0 sm:$0xff] }
0x1477   :  { %2335 = vadd.xlane.f32.xlu1 %v2334_v53  ;;  %v2331_v8 = vsel %vm64_vm0, %v2329_v52, 0.0 }
0x1478   :  { %2332 = vadd.xlane.f32.xlu0 %v2331_v8 }
0x1504   :  { %v2336_v59 = vpop.xlane.xlu1 %2335 }
0x1505   :  { %v2338_v61 = vmul.f32 0.03125, %v2336_v59  ;;  %v2333_v62 = vpop.xlane.xlu0 %2332 }
0x1506   :  { %v2337_v63 = vmul.f32 0.03125, %v2333_v62 }
0x1507   :  { %v2340_v0 = vadd.f32 1e-12, %v2338_v61 }
0x1508   :  { %v2339_v1 = vadd.f32 1e-12, %v2337_v63 }
0x1509   :  { %3354 = vrsqrt.f32 %v2340_v0 }
0x150a   :  { %3356 = vrsqrt.f32 %v2339_v1 }
0x1513   :  { %v3355_v41 = vpop.eup %3354 }
0x1514   :  { %v3357_v3 = vpop.eup %3356  ;;  %v2344_v4 = vmul.f32 %v3355_v41, %v2328_v49 }
0x1515   :  { %v2343_v5 = vmul.f32 %v3357_v3, %v2327_v50 }
0x1516   :  { %v2352_v54 = vmul.f32 %v2865_v2, %v2344_v4  ;;  %v3398_v4 = vmov 0.0|0.0  }
0x1517   :  { %v2351_v9 = vmul.f32 %v2865_v2, %v2343_v5  ;;  %3283 = vmatprep.subr.bf16.mxu1 %v3398_v4 }
0x1518   :  { %v2360_v12 = vadd.f32 %v2866_v6, %v2352_v54 }
0x1519   :  { %v2359_v10 = vadd.f32 %v2866_v6, %v2351_v9 }
0x151b   :  { %3163 = vmatprep.mubr.msk.f32.mxu1 %vm64_vm0, %v2359_v10 }
0x151c   :  { %3164 = vmatmul.mubr.msk.f32.vlgmr.msra.gmra.mrb[24].mxu1 %vm64_vm0, %v2360_v12 }
0x151d   :  { %3189 = vmatprep.mubr.msk.f32.mxu1 %vm3391_vm1, %v3390_v36 }
0x15ef   :  { %v3165_v24 = vpop.f32.mrb[24].mxu1 }
0x15f0   :  { %v2452_v25 = vadd.f32 %v3165_v24, %v2872_v23  ;;  %v2446_v26 = vpop.f32.mrb[25].mxu1  ;;  %v2701_v24 = vld [vmem:[%s3946_s16 + $0x8] sm:$0xff] }
0x15f1   :  { %v2447_v27 = vadd.f32 %v2872_v23, %v2446_v26  ;;  %v2700_v23 = vld [vmem:[%s3946_s16] sm:$0xff]  ;;  %v2891_v26 = vsel %vm2624_vm5, 1.0, %v3390_v36  ;;  %s3366_s16 = scalar_lea.vmem %s2793_s24, 32 }
0x15f2   :  { %v2458_v35 = vmul.f32 0.044715, %v2452_v25  ;;  %v2456_v47 = vmul.f32 0.5, %v2452_v25  ;;  %p3367_p0 = scmp.ne.s32.totalorder %s2793_s24, %s3366_s16  ;;  %p3372_p2 = scmp.lt.s32.totalorder %s3366_s16, %s3366_s16 }
0x15f3   :  { %v2457_v33 = vmul.f32 0.044715, %v2447_v27  ;;  %v2455_v44 = vmul.f32 0.5, %v2447_v27 }
0x15f4   :  { %v2460_v28 = vmul.f32 %v2458_v35, %v2452_v25  ;;  %v3290_v35 = vpack.c.bf16 %v2703_v48, %v2702_v46  ;;  %p3373_p3 = por %p3372_p2, %p3371_p1 }
0x15f5   :  { %v2459_v29 = vmul.f32 %v2457_v33, %v2447_v27 }
0x15f6   :  { %v2462_v30 = vmul.f32 %v2460_v28, %v2452_v25  ;;  %p3374_p4 = pnand %p3373_p3, %p3367_p0 }
0x15f7   :  { %v2461_v31 = vmul.f32 %v2459_v29, %v2447_v27  ;;  %v2893_v29 = vld [vmem:[%s3947_s17] ss:$0 sm:$0xff] }
0x15f8   :  { %v2464_v32 = vadd.f32 %v2462_v30, %v2452_v25 }
0x15f9   :  { %v2463_v34 = vadd.f32 %v2461_v31, %v2447_v27  ;;  %v3287_v27 = vpack.c.bf16 %v2701_v24, %v2700_v23 }
0x15fa   :  { %v2466_v37 = vmul.f32 0.7978846, %v2464_v32 }
0x15fb   :  { %v2465_v38 = vmul.f32 0.7978846, %v2463_v34 }
0x15fc   :  { %3358 = vtanh.f32 %v2466_v37 }
0x15fd   :  { %3360 = vtanh.f32 %v2465_v38 }
0x1606   :  { %v3359_v40 = vpop.eup %3358 }
0x1607   :  { %v3361_v42 = vpop.eup %3360  ;;  %v2470_v43 = vadd.f32 1.0, %v3359_v40 }
0x1608   :  { %v2469_v45 = vadd.f32 1.0, %v3361_v42 }
0x1609   :  { %v2472_v50 = vmul.f32 %v2470_v43, %v2456_v47 }
0x160a   :  { %v2471_v49 = vmul.f32 %v2469_v45, %v2455_v44 }
0x160c   :  { %3182 = vmatprep.mubr.msk.f32.mxu0 %vm1248_vm4, %v2471_v49 }
0x160d   :  { %3183 = vmatmul.mubr.msk.f32.vlgmr.msra.gmra.mrb[20].mxu0 %vm1248_vm4, %v2472_v50 }
0x16e0   :  { %v3184_v52 = vpop.f32.mrb[20].mxu0 }
0x16e1   :  { %v2568_v53 = vadd.f32 %v3184_v52, %v2884_v51  ;;  %v2562_v8 = vpop.f32.mrb[21].mxu0 }
0x16e2   :  { %v2563_v7 = vadd.f32 %v2884_v51, %v2562_v8 }
0x16e3   :  { %v2572_v55 = vadd.f32 %v2568_v53, %v2360_v12 }
0x16e4   :  { %v2571_v56 = vadd.f32 %v2563_v7, %v2359_v10 }
0x16e5   :  { %v2580_v57 = vsel %vm64_vm0, %v2572_v55, 0.0 }
0x16e6   :  { %2581 = vadd.xlane.f32.xlu1 %v2580_v57  ;;  %v2577_v39 = vsel %vm64_vm0, %v2571_v56, 0.0 }
0x16e7   :  { %2578 = vadd.xlane.f32.xlu0 %v2577_v39 }
0x1773   :  { %v2582_v58 = vpop.xlane.xlu1 %2581 }
0x1774   :  { %v2584_v59 = vmul.f32 0.03125, %v2582_v58  ;;  %v2579_v61 = vpop.xlane.xlu0 %2578 }
0x1775   :  { %v2583_v62 = vmul.f32 0.03125, %v2579_v61 }
0x1776   :  { %v2586_v63 = vsub.f32 %v2572_v55, %v2584_v59 }
0x1777   :  { %v2585_v0 = vsub.f32 %v2571_v56, %v2583_v62 }
0x1778   :  { %v2588_v1 = vmul.f32 %v2586_v63, %v2586_v63 }
0x1779   :  { %v2587_v41 = vmul.f32 %v2585_v0, %v2585_v0 }
0x177a   :  { %v2592_v2 = vsel %vm64_vm0, %v2588_v1, 0.0 }
0x177b   :  { %2593 = vadd.xlane.f32.xlu1 %v2592_v2  ;;  %v2589_v3 = vsel %vm64_vm0, %v2587_v41, 0.0 }
0x177c   :  { %2590 = vadd.xlane.f32.xlu0 %v2589_v3 }
0x1808   :  { %v2594_v5 = vpop.xlane.xlu1 %2593 }
0x1809   :  { %v2596_v6 = vmul.f32 0.03125, %v2594_v5  ;;  %v2591_v54 = vpop.xlane.xlu0 %2590 }
0x180a   :  { %v2595_v9 = vmul.f32 0.03125, %v2591_v54 }
0x180b   :  { %v2598_v10 = vadd.f32 1e-12, %v2596_v6 }
0x180c   :  { %v2597_v12 = vadd.f32 1e-12, %v2595_v9 }
0x180d   :  { %3362 = vrsqrt.f32 %v2598_v10 }
0x180e   :  { %3364 = vrsqrt.f32 %v2597_v12 }
0x1817   :  { %v3363_v14 = vpop.eup %3362 }
0x1818   :  { %v3365_v15 = vpop.eup %3364  ;;  %v2602_v11 = vmul.f32 %v3363_v14, %v2586_v63 }
0x1819   :  { %v2601_v16 = vmul.f32 %v3365_v15, %v2585_v0 }
0x181a   :  { %v2610_v18 = vmul.f32 %v2889_v60, %v2602_v11 }
0x181b   :  { %v2609_v21 = vmul.f32 %v2889_v60, %v2601_v16 }
0x181c   :  { %v2618_v22 = vadd.f32 %v2890_v17, %v2610_v18 }
0x181d   :  { %v2617_v13 = vadd.f32 %v2890_v17, %v2609_v21 }
0x181f   :  { %v3284_v25 = vpack.c.bf16 %v2618_v22, %v2617_v13 }
0x1821   :  { %3285 = vmatpush3.bf16.msra.mxu1 %v3284_v25 }
0x1822   :  { %3286 = vmatprep.subr.bf16.mxu1 %v3398_v4 }
0x1824   :  { %3190 = vmatmul.mubr.msk.f32.vlgmr.msra.gmra.mrb[26].mxu1 %vm231_vm2, %v2891_v26 }
0x1825   :  { %3288 = vmatpush3.bf16.msra.mxu1 %v3287_v27  ;;  %3200 = vmatprep.mubr.msk.f32.mxu1 %vm3391_vm1, %v3390_v36 }
0x1826   :  { %3289 = vmatprep.subr.bf16.mxu1 %v3398_v4 }
0x1829   :  { %3291 = vmatpush3.bf16.msra.mxu1 %v3290_v35 }
0x18f7   :  { %v2696_v33 = vpop.f32.mrb[26].mxu1 }
0x18f8   :  { %v3191_v28 = vpop.f32.mrb[27].mxu1  ;;  %3201 = vmatmul.mubr.msk.f32.vlgmr.msra.gmra.mrb[28].mxu1 %vm64_vm0, %v2696_v33 }
0x19cb   :  { %v2780_v30 = vpop.f32.mrb[28].mxu1 }
0x19cc   :  { %v2781_v31 = vadd.f32 %v2893_v29, %v2780_v30  ;;  %v3202_v32 = vpop.f32.mrb[29].mxu1 }
0x19ce   :  { %2785 = vst.msk [vmem:[#allocation2] sm:$0x3] %vm2784_vm6, %v2781_v31 }
0x19cf   :  { %3377 = shalt.err (!%p3374_p4)
}
0x19d0   :  { %s3378_s27 = scalar_lea.hbm %s3948_s18, 32 }
0x19d1   :  { %p3379_p5 = scmp.ne.s32.totalorder %s3948_s18, %s3378_s27  ;;  %p3382_p6 = scmp.lt.u32.totalorder %s3378_s27, %s3948_s18 }
0x19d3   :  { %p3384_p7 = pnand %p3382_p6, %p3379_p5 }
0x19d5   :  { %3387 = shalt.err (!%p3384_p7)
}
0x19d6   :  { %2795 = dma.vmem_to_hbm [thread:$0]  %s2793_s24, 32, %s3948_s18, [#allocation3]  }
0x19d7   :  { %3388 = dma.done.wait [#allocation3], 32  }
0x19d8   :  { %3389 = vsyncadd [#allocation3], 4294967264 }
0x19d9   :  { %2799 = vsyncpa [#allocation3], 1 }

</bundles_post_ra>
